<compile_context>
chip_gen: v5e
topology: v5e:2x2
jax: 0.10.0
libtpu: 0.0.40
codegen_flags: <defaults>
</compile_context>

<pallas_src>
import functools

import jax
import jax.numpy as jnp
from jax import lax
from jax.experimental import pallas as pl
from jax.experimental.pallas import tpu as pltpu


def _round_up(x, m):
    return (x + m - 1) // m * m


# ----------------------------------------------------------------------------
# Kernel 1: cv1 = 3x3 conv (no im2col slab) + folded BN + SiLU.
# ----------------------------------------------------------------------------
def _cv1_kernel(x_ref, w_ref, scale_ref, bias_ref, o_ref, *, taps, tile, tile_in):
    # x_ref:      (Cin, S_in_p)  bf16  zero-padded image flattened to (H+2)*(W+2)
    #                                  (+ tail zeros); whole array resident per batch.
    # w_ref:      (9, Cout, Cin) bf16  w[dh*3+dw, cout, cin] = torch_w[cout, cin, dh, dw]
    # scale/bias: (Cout, 1)      f32   folded BatchNorm
    # o_ref:      (Cout, TILE)   f32   one lane-dense tile of the padded output
    start = pl.multiple_of(pl.program_id(1) * tile, 128)
    window = x_ref[:, pl.ds(start, tile_in)]              # one aligned dynamic load
    acc = jnp.dot(w_ref[0], window[:, taps[0]:taps[0] + tile],
                  preferred_element_type=jnp.float32)
    for t in range(1, 9):                                  # 9 shifted MXU matmuls
        acc = acc + jnp.dot(w_ref[t], window[:, taps[t]:taps[t] + tile],
                            preferred_element_type=jnp.float32)
    y = acc * scale_ref[...] + bias_ref[...]               # folded BN
    o_ref[...] = y * jax.nn.sigmoid(y)                     # SiLU (kept f32)


def _cv1_tile(s_out, cin, cout, halo, budget=12 * 1024 * 1024):
    """Largest multiple-of-128 output tile that keeps the blocks under `budget`."""
    s_res = _round_up(s_out, 128) + halo + 1024             # resident input estimate
    resident = 2 * cin * s_res * 2                          # input double-buffer (bf16)
    resident += 2 * 9 * cout * cin * 2 + 4 * cout * 8       # weights dbuf + BN params
    per_col = 2 * cout * 4 + 4 * cin * 2                    # out dbuf + window temps
    avail = max(budget - resident, 128 * per_col)
    tile = max((avail // per_col) // 128 * 128, 128)
    return int(min(tile, 1024, _round_up(s_out, 128)))


def conv3x3_bn_silu(x, w9, scale, bias):
    """x: (B, Cin, H, W) f32 -> (B, Cout, H, W) f32."""
    B, Cin, H, W = x.shape
    Cout = w9.shape[1]
    Wp = W + 2

    # Zero-pad H/W by 1 and flatten the padded spatial grid.  Output position
    # p = h*(W+2)+w then needs input positions p + dh*(W+2) + dw for the 9 taps
    # (the 2 extra columns per row produce garbage that is sliced off below).
    xp = jnp.pad(x, ((0, 0), (0, 0), (1, 1), (1, 1))).astype(jnp.bfloat16)
    xflat = xp.reshape(B, Cin, (H + 2) * Wp)

    s_out = H * Wp                                          # padded-output columns
    halo = _round_up(2 * Wp + 2, 128)                        # max tap offset, rounded
    tile = _cv1_tile(s_out, Cin, Cout, halo)
    s_out_p = _round_up(s_out, tile)                         # handles S % 128 != 0
    s_in_p = s_out_p + halo
    xflat = jnp.pad(xflat, ((0, 0), (0, 0), (0, s_in_p - (H + 2) * Wp)))

    taps = tuple(dh * Wp + dw for dh in range(3) for dw in range(3))
    grid = (B, s_out_p // tile)
    kernel = functools.partial(_cv1_kernel, taps=taps, tile=tile,
                               tile_in=tile + halo)

    flops = 2 * B * s_out_p * 9 * Cin * Cout
    bytes_accessed = (B * Cin * s_in_p * 2 + 9 * Cout * Cin * 2
                      + B * Cout * s_out_p * 4)

    # TODO(synk): for very large H*W the per-batch resident input should itself
    # be row-tiled (halo via manual make_async_copy) instead of whole-image.
    out = pl.pallas_call(
        kernel,
        out_shape=jax.ShapeDtypeStruct((B, Cout, s_out_p), jnp.float32),
        grid_spec=pltpu.PrefetchScalarGridSpec(
            num_scalar_prefetch=0,
            grid=grid,
            in_specs=[
                pl.BlockSpec((None, Cin, s_in_p), lambda b, s: (b, 0, 0)),
                pl.BlockSpec((9, Cout, Cin), lambda b, s: (0, 0, 0)),
                pl.BlockSpec((Cout, 1), lambda b, s: (0, 0)),
                pl.BlockSpec((Cout, 1), lambda b, s: (0, 0)),
            ],
            out_specs=pl.BlockSpec((None, Cout, tile), lambda b, s: (b, 0, s)),
        ),
        compiler_params=pltpu.CompilerParams(
            dimension_semantics=("parallel", "parallel"),
            vmem_limit_bytes=32 * 1024 * 1024),
        cost_estimate=pl.CostEstimate(
            flops=int(flops),
            transcendentals=int(B * s_out_p * Cout),
            bytes_accessed=int(bytes_accessed)),
    )(xflat, w9.astype(jnp.bfloat16), scale, bias)

    # Drop the 2 wrap-around garbage columns per row (the slice fuses with the
    # FFT input copy in XLA).
    # TODO(synk): optionally emit this in bf16 to halve the writeback; kept f32
    # pending a numerics check since it feeds the FFT.
    return out[:, :, :H * Wp].reshape(B, Cout, H, Wp)[:, :, :, :W]


# ----------------------------------------------------------------------------
# Kernel 2: FSDA processmag / processpha, N-tiled with a two-pass SELayer.
# ----------------------------------------------------------------------------
def _fsda_kernel(x_ref, w1_ref, b1_ref, l1t_ref, l2_ref, w2_ref, b2_ref,
                 o_ref, sum_sc, scale_sc, *, n_valid):
    # Grid: (batch, branch, pass, n_tile).  x_ref/o_ref: (C, TN) f32.
    # Weights (branch selected via index_map): w1/w2 (C, C), b1/b2 (C, 1),
    # l1t (C, hid) = SE Linear(c->hid).T, l2 (C, hid) = SE Linear(hid->c).
    p = pl.program_id(2)
    n = pl.program_id(3)
    tn = x_ref.shape[1]

    x = x_ref[...]
    y = jnp.dot(w1_ref[...], x, preferred_element_type=jnp.float32) + b1_ref[...]
    y = jnp.where(y >= 0.0, y, 0.1 * y)                     # LeakyReLU(0.1)

    @pl.when((p == 0) & (n == 0))
    def _():
        sum_sc[...] = jnp.zeros_like(sum_sc)

    @pl.when(p == 0)
    def _():
        # SE global-sum accumulation; mask zero-padded spectrum columns so the
        # pooled mean stays a reduction over ALL (and only) the N valid bins.
        col = n * tn + lax.broadcasted_iota(jnp.int32, y.shape, 1)
        sum_sc[...] += jnp.sum(jnp.where(col < n_valid, y, 0.0),
                               axis=1, keepdims=True)

    @pl.when((p == 1) & (n == 0))
    def _():
        pooled = sum_sc[...] * (1.0 / n_valid)               # (C, 1) global mean
        h = jnp.sum(l1t_ref[...] * pooled, axis=0, keepdims=True)   # Linear c->hid
        h = jnp.maximum(h, 0.0)                                      # ReLU
        s = jnp.sum(l2_ref[...] * h, axis=1, keepdims=True)          # Linear hid->c
        scale_sc[...] = jax.nn.sigmoid(s)                            # (C, 1)

    @pl.when(p == 1)
    def _():
        z = jnp.dot(w2_ref[...], y * scale_sc[...],
                    preferred_element_type=jnp.float32) + b2_ref[...]
        o_ref[...] = x + z                                   # ori + processed


def _fsda_tile(n, c, hid, budget=12 * 1024 * 1024):
    resident = 2 * (2 * c * c + 2 * c + 2 * c * hid) * 4 + 2 * c * 4
    per_col = 2 * c * 4 + 2 * c * 4 + 4 * c                  # x dbuf + out dbuf + temps
    avail = max(budget - resident, 128 * per_col)
    tile = max((avail // per_col) // 128 * 128, 128)
    return int(min(tile, 1024, _round_up(n, 128)))


def fsda_process(mag, pha, w1, b1, l1t, l2, w2, b2):
    """Both FSDA branches.  mag/pha: (B, C, N) f32 -> (mag_out, pha_out)."""
    B, C, N = mag.shape
    hid = l1t.shape[-1]
    tn = _fsda_tile(N, C, hid)
    Np = _round_up(N, tn)

    # Stack the branches on a leading axis (abs/angle/stack/pad fuse in XLA) so
    # "branch" becomes a parallel grid axis selecting the weight blocks.
    mp = jnp.stack([mag, pha], axis=1)                       # (B, 2, C, N)
    if Np != N:
        mp = jnp.pad(mp, ((0, 0), (0, 0), (0, 0), (0, Np - N)))

    nt = Np // tn
    grid = (B, 2, 2, nt)                                     # (batch, branch, pass, tile)
    kernel = functools.partial(_fsda_kernel, n_valid=N)

    flops = 12 * B * C * C * Np
    bytes_accessed = 3 * B * 2 * C * Np * 4 + 2 * (2 * C * C + 2 * C * hid + 2 * C) * 4

    out = pl.pallas_call(
        kernel,
        out_shape=jax.ShapeDtypeStruct((B, 2, C, Np), jnp.float32),
        grid_spec=pltpu.PrefetchScalarGridSpec(
            num_scalar_prefetch=0,
            grid=grid,
            in_specs=[
                pl.BlockSpec((None, None, C, tn), lambda b, br, p, n: (b, br, 0, n)),
                pl.BlockSpec((None, C, C), lambda b, br, p, n: (br, 0, 0)),
                pl.BlockSpec((None, C, 1), lambda b, br, p, n: (br, 0, 0)),
                pl.BlockSpec((None, C, hid), lambda b, br, p, n: (br, 0, 0)),
                pl.BlockSpec((None, C, hid), lambda b, br, p, n: (br, 0, 0)),
                pl.BlockSpec((None, C, C), lambda b, br, p, n: (br, 0, 0)),
                pl.BlockSpec((None, C, 1), lambda b, br, p, n: (br, 0, 0)),
            ],
            # n*p keeps the output block index frozen during pass 0 (nothing is
            # written back then) and walks the tiles during pass 1.
            out_specs=pl.BlockSpec((None, None, C, tn),
                                   lambda b, br, p, n: (b, br, 0, n * p)),
            scratch_shapes=[pltpu.VMEM((C, 1), jnp.float32),   # SE global sum
                            pltpu.VMEM((C, 1), jnp.float32)],  # SE sigmoid scale
        ),
        compiler_params=pltpu.CompilerParams(
            dimension_semantics=("parallel", "parallel", "arbitrary", "arbitrary"),
            vmem_limit_bytes=32 * 1024 * 1024),
        cost_estimate=pl.CostEstimate(
            flops=int(flops),
            transcendentals=int(2 * B * C),
            bytes_accessed=int(bytes_accessed)),
    )(mp, w1, b1, l1t, l2, w2, b2)

    return out[:, 0, :, :N], out[:, 1, :, :N]


# ----------------------------------------------------------------------------
# Full Bottleneck_FSDA forward (NCHW in / NCHW out, like PyTorch).
# ----------------------------------------------------------------------------
def bottleneck_fsda_forward(x, params, add):
    B, _, H, W = x.shape
    c_ = params["cv1_w9"].shape[1]

    y = conv3x3_bn_silu(x, params["cv1_w9"], params["cv1_scale"],
                        params["cv1_bias"])                  # (B, c_, H, W) f32

    # TODO(synk): rfft2/irfft2 have no Pallas primitive; they (and the complex
    # abs/angle/cos/sin glue) run as XLA ops -- Pallas refs cannot hold complex64.
    xf = jnp.fft.rfft2(y, axes=(-2, -1))                     # norm='backward'
    Hf, Wf = xf.shape[-2], xf.shape[-1]
    N = Hf * Wf
    ori_mag = jnp.abs(xf).astype(jnp.float32).reshape(B, c_, N)
    ori_pha = jnp.angle(xf).astype(jnp.float32).reshape(B, c_, N)

    mag, pha = fsda_process(ori_mag, ori_pha, params["w1"], params["b1"],
                            params["l1t"], params["l2"], params["w2"], params["b2"])
    mag = mag.reshape(B, c_, Hf, Wf)
    pha = pha.reshape(B, c_, Hf, Wf)

    x_out = lax.complex(mag * jnp.cos(pha), mag * jnp.sin(pha))
    out = jnp.fft.irfft2(x_out, s=(H, W), axes=(-2, -1)).astype(jnp.float32)
    return x + out if add else out


# ----------------------------------------------------------------------------
# Pure-JAX reference (same bf16 conv-input numerics) for a correctness check.
# ----------------------------------------------------------------------------
def _ref_forward(x, params, add):
    B, Cin, H, W = x.shape
    w9 = params["cv1_w9"]
    Cout = w9.shape[1]
    wt = w9.reshape(3, 3, Cout, Cin).transpose(2, 3, 0, 1)    # OIHW
    y = lax.conv_general_dilated(
        x.astype(jnp.bfloat16), wt.astype(jnp.bfloat16), (1, 1), "SAME",
        dimension_numbers=("NCHW", "OIHW", "NCHW"),
        preferred_element_type=jnp.float32)
    y = (y * params["cv1_scale"][:, 0][None, :, None, None]
         + params["cv1_bias"][:, 0][None, :, None, None])
    y = y * jax.nn.sigmoid(y)

    xf = jnp.fft.rfft2(y, axes=(-2, -1))
    Hf, Wf = xf.shape[-2], xf.shape[-1]
    N = Hf * Wf
    mag0 = jnp.abs(xf).astype(jnp.float32).reshape(B, Cout, N)
    pha0 = jnp.angle(xf).astype(jnp.float32).reshape(B, Cout, N)

    def branch(z, i):
        y1 = jnp.einsum("oc,bcn->bon", params["w1"][i], z) + params["b1"][i][None]
        y1 = jnp.where(y1 >= 0.0, y1, 0.1 * y1)
        pooled = y1.mean(axis=2)                              # (B, C)
        h = jnp.maximum(pooled @ params["l1t"][i], 0.0)       # (B, hid)
        s = jax.nn.sigmoid(h @ params["l2"][i].T)             # (B, C)
        y2 = y1 * s[:, :, None]
        y2 = jnp.einsum("oc,bcn->bon", params["w2"][i], y2) + params["b2"][i][None]
        return z + y2

    mag = branch(mag0, 0).reshape(B, Cout, Hf, Wf)
    pha = branch(pha0, 1).reshape(B, Cout, Hf, Wf)
    x_out = lax.complex(mag * jnp.cos(pha), mag * jnp.sin(pha))
    out = jnp.fft.irfft2(x_out, s=(H, W), axes=(-2, -1)).astype(jnp.float32)
    return x + out if add else out


if __name__ == "__main__":
    key = jax.random.PRNGKey(0)
    # Small shapes.  e=1.0 so c_ == c1 and the shortcut add is shape-valid
    # (with the default e=0.5 and c1==c2 the PyTorch module itself would fail),
    # and so SELayer's hidden dim c_//16 >= 1.
    B, H, W = 2, 16, 16
    c1 = c2 = 16
    e = 1.0
    shortcut = True
    c_ = int(c2 * e)                 # 16
    reduction = 16
    hid = max(c_ // reduction, 1)    # 1

    ks = list(jax.random.split(key, 8))

    def nrm(k, shape, scale=0.1):
        return scale * jax.random.normal(k, shape, jnp.float32)

    params = {
        # cv1 conv weight, tap-major: cv1_w9[dh*3+dw, co, ci] = torch_w[co, ci, dh, dw]
        "cv1_w9": nrm(ks[1], (9, c_, c1), 0.05),
        # Folded BatchNorm (scale = gamma/sqrt(var+eps), bias = beta - mean*scale).
        "cv1_scale": (1.0 + 0.01 * jnp.arange(c_, dtype=jnp.float32))[:, None],
        "cv1_bias": (0.02 * jnp.arange(c_, dtype=jnp.float32) - 0.1)[:, None],
        # FSDA weights stacked along axis 0: [0] = processmag, [1] = processpha.
        "w1": nrm(ks[2], (2, c_, c_)),           # 1x1 conv #1 weight
        "b1": nrm(ks[3], (2, c_, 1)),            # 1x1 conv #1 bias
        "l1t": nrm(ks[4], (2, c_, hid), 0.3),    # SE Linear(c_->hid) weight (transposed)
        "l2": nrm(ks[5], (2, c_, hid), 0.3),     # SE Linear(hid->c_) weight
        "w2": nrm(ks[6], (2, c_, c_)),           # 1x1 conv #2 weight
        "b2": nrm(ks[7], (2, c_, 1)),            # 1x1 conv #2 bias
    }

    x = jax.random.normal(ks[0], (B, c1, H, W), jnp.float32)
    add = shortcut and (c1 == c2)

    fwd = jax.jit(lambda xx, pp: bottleneck_fsda_forward(xx, pp, add))
    out = jax.block_until_ready(fwd(x, params))

    assert out.shape == (B, c2, H, W) and out.dtype == jnp.float32
    assert bool(jnp.all(jnp.isfinite(out)))

    ref = jax.block_until_ready(
        jax.jit(lambda xx, pp: _ref_forward(xx, pp, add))(x, params))
    err = float(jnp.max(jnp.abs(out - ref)))
    assert err < 3e-2, f"max abs error vs pure-JAX reference: {err}"

    print("KERNEL_OK")
</pallas_src>

<mosaic_0001>
module attributes {stable_mosaic.version = 11 : i64} {
  func.func @_cv1_kernel(%arg0: i32, %arg1: i32, %arg2: memref<1x16x512xbf16, #tpu.memory_space<vmem>>, %arg3: memref<9x16x16xbf16, #tpu.memory_space<vmem>>, %arg4: memref<16x1xf32, #tpu.memory_space<vmem>>, %arg5: memref<16x1xf32, #tpu.memory_space<vmem>>, %arg6: memref<1x16x384xf32, #tpu.memory_space<vmem>>) attributes {dimension_semantics = [#tpu.dimension_semantics<parallel>, #tpu.dimension_semantics<parallel>], iteration_bounds = array<i64: 2, 1>, scalar_prefetch = 0 : i64, scratch_operands = 0 : i64, tpu.core_type = #tpu.core_type<tc>, window_params = [{transform_indices = @transform_0, window_bounds = array<i64: 1, 16, 512>}, {pipeline_mode = #tpu.pipeline_mode<synchronous>, transform_indices = @transform_1, window_bounds = array<i64: 9, 16, 16>}, {pipeline_mode = #tpu.pipeline_mode<synchronous>, transform_indices = @transform_2, window_bounds = array<i64: 16, 1>}, {pipeline_mode = #tpu.pipeline_mode<synchronous>, transform_indices = @transform_3, window_bounds = array<i64: 16, 1>}, {transform_indices = @transform_4, window_bounds = array<i64: 1, 16, 384>}]} {
    %c384_i32 = arith.constant 384 : i32
    %0 = arith.muli %arg1, %c384_i32 : i32
    %1 = tpu.assume_multiple %0, 128 : i32
    %c0 = arith.constant 0 : index
    %c0_0 = arith.constant 0 : index
    %2 = arith.index_cast %1 : i32 to index
    %3 = vector.load %arg2[%c0, %c0_0, %2] : memref<1x16x512xbf16, #tpu.memory_space<vmem>>, vector<1x16x512xbf16>
    %4 = vector.shape_cast %3 : vector<1x16x512xbf16> to vector<16x512xbf16>
    %c0_1 = arith.constant 0 : index
    %c0_2 = arith.constant 0 : index
    %c0_3 = arith.constant 0 : index
    %5 = vector.load %arg3[%c0_1, %c0_2, %c0_3] : memref<9x16x16xbf16, #tpu.memory_space<vmem>>, vector<1x16x16xbf16>
    %6 = vector.shape_cast %5 : vector<1x16x16xbf16> to vector<16x16xbf16>
    %7 = vector.extract_strided_slice %4 {offsets = [0, 0], sizes = [16, 384], strides = [1, 1]} : vector<16x512xbf16> to vector<16x384xbf16>
    %cst = arith.constant dense<0.000000e+00> : vector<16x384xf32>
    %8 = tpu.matmul %6, %7, %cst {dimension_numbers = #tpu.dot_dimension_numbers<[1], [0], [0], [1], [0, 0, 1, 1], [], []>} : vector<16x16xbf16>, vector<16x384xbf16>, vector<16x384xf32> -> vector<16x384xf32>
    %c1 = arith.constant 1 : index
    %c0_4 = arith.constant 0 : index
    %c0_5 = arith.constant 0 : index
    %9 = vector.load %arg3[%c1, %c0_4, %c0_5] : memref<9x16x16xbf16, #tpu.memory_space<vmem>>, vector<1x16x16xbf16>
    %10 = vector.shape_cast %9 : vector<1x16x16xbf16> to vector<16x16xbf16>
    %11 = vector.extract_strided_slice %4 {offsets = [0, 1], sizes = [16, 384], strides = [1, 1]} : vector<16x512xbf16> to vector<16x384xbf16>
    %cst_6 = arith.constant dense<0.000000e+00> : vector<16x384xf32>
    %12 = tpu.matmul %10, %11, %cst_6 {dimension_numbers = #tpu.dot_dimension_numbers<[1], [0], [0], [1], [0, 0, 1, 1], [], []>} : vector<16x16xbf16>, vector<16x384xbf16>, vector<16x384xf32> -> vector<16x384xf32>
    %13 = arith.addf %8, %12 : vector<16x384xf32>
    %c2 = arith.constant 2 : index
    %c0_7 = arith.constant 0 : index
    %c0_8 = arith.constant 0 : index
    %14 = vector.load %arg3[%c2, %c0_7, %c0_8] : memref<9x16x16xbf16, #tpu.memory_space<vmem>>, vector<1x16x16xbf16>
    %15 = vector.shape_cast %14 : vector<1x16x16xbf16> to vector<16x16xbf16>
    %16 = vector.extract_strided_slice %4 {offsets = [0, 2], sizes = [16, 384], strides = [1, 1]} : vector<16x512xbf16> to vector<16x384xbf16>
    %cst_9 = arith.constant dense<0.000000e+00> : vector<16x384xf32>
    %17 = tpu.matmul %15, %16, %cst_9 {dimension_numbers = #tpu.dot_dimension_numbers<[1], [0], [0], [1], [0, 0, 1, 1], [], []>} : vector<16x16xbf16>, vector<16x384xbf16>, vector<16x384xf32> -> vector<16x384xf32>
    %18 = arith.addf %13, %17 : vector<16x384xf32>
    %c3 = arith.constant 3 : index
    %c0_10 = arith.constant 0 : index
    %c0_11 = arith.constant 0 : index
    %19 = vector.load %arg3[%c3, %c0_10, %c0_11] : memref<9x16x16xbf16, #tpu.memory_space<vmem>>, vector<1x16x16xbf16>
    %20 = vector.shape_cast %19 : vector<1x16x16xbf16> to vector<16x16xbf16>
    %21 = vector.extract_strided_slice %4 {offsets = [0, 18], sizes = [16, 384], strides = [1, 1]} : vector<16x512xbf16> to vector<16x384xbf16>
    %cst_12 = arith.constant dense<0.000000e+00> : vector<16x384xf32>
    %22 = tpu.matmul %20, %21, %cst_12 {dimension_numbers = #tpu.dot_dimension_numbers<[1], [0], [0], [1], [0, 0, 1, 1], [], []>} : vector<16x16xbf16>, vector<16x384xbf16>, vector<16x384xf32> -> vector<16x384xf32>
    %23 = arith.addf %18, %22 : vector<16x384xf32>
    %c4 = arith.constant 4 : index
    %c0_13 = arith.constant 0 : index
    %c0_14 = arith.constant 0 : index
    %24 = vector.load %arg3[%c4, %c0_13, %c0_14] : memref<9x16x16xbf16, #tpu.memory_space<vmem>>, vector<1x16x16xbf16>
    %25 = vector.shape_cast %24 : vector<1x16x16xbf16> to vector<16x16xbf16>
    %26 = vector.extract_strided_slice %4 {offsets = [0, 19], sizes = [16, 384], strides = [1, 1]} : vector<16x512xbf16> to vector<16x384xbf16>
    %cst_15 = arith.constant dense<0.000000e+00> : vector<16x384xf32>
    %27 = tpu.matmul %25, %26, %cst_15 {dimension_numbers = #tpu.dot_dimension_numbers<[1], [0], [0], [1], [0, 0, 1, 1], [], []>} : vector<16x16xbf16>, vector<16x384xbf16>, vector<16x384xf32> -> vector<16x384xf32>
    %28 = arith.addf %23, %27 : vector<16x384xf32>
    %c5 = arith.constant 5 : index
    %c0_16 = arith.constant 0 : index
    %c0_17 = arith.constant 0 : index
    %29 = vector.load %arg3[%c5, %c0_16, %c0_17] : memref<9x16x16xbf16, #tpu.memory_space<vmem>>, vector<1x16x16xbf16>
    %30 = vector.shape_cast %29 : vector<1x16x16xbf16> to vector<16x16xbf16>
    %31 = vector.extract_strided_slice %4 {offsets = [0, 20], sizes = [16, 384], strides = [1, 1]} : vector<16x512xbf16> to vector<16x384xbf16>
    %cst_18 = arith.constant dense<0.000000e+00> : vector<16x384xf32>
    %32 = tpu.matmul %30, %31, %cst_18 {dimension_numbers = #tpu.dot_dimension_numbers<[1], [0], [0], [1], [0, 0, 1, 1], [], []>} : vector<16x16xbf16>, vector<16x384xbf16>, vector<16x384xf32> -> vector<16x384xf32>
    %33 = arith.addf %28, %32 : vector<16x384xf32>
    %c6 = arith.constant 6 : index
    %c0_19 = arith.constant 0 : index
    %c0_20 = arith.constant 0 : index
    %34 = vector.load %arg3[%c6, %c0_19, %c0_20] : memref<9x16x16xbf16, #tpu.memory_space<vmem>>, vector<1x16x16xbf16>
    %35 = vector.shape_cast %34 : vector<1x16x16xbf16> to vector<16x16xbf16>
    %36 = vector.extract_strided_slice %4 {offsets = [0, 36], sizes = [16, 384], strides = [1, 1]} : vector<16x512xbf16> to vector<16x384xbf16>
    %cst_21 = arith.constant dense<0.000000e+00> : vector<16x384xf32>
    %37 = tpu.matmul %35, %36, %cst_21 {dimension_numbers = #tpu.dot_dimension_numbers<[1], [0], [0], [1], [0, 0, 1, 1], [], []>} : vector<16x16xbf16>, vector<16x384xbf16>, vector<16x384xf32> -> vector<16x384xf32>
    %38 = arith.addf %33, %37 : vector<16x384xf32>
    %c7 = arith.constant 7 : index
    %c0_22 = arith.constant 0 : index
    %c0_23 = arith.constant 0 : index
    %39 = vector.load %arg3[%c7, %c0_22, %c0_23] : memref<9x16x16xbf16, #tpu.memory_space<vmem>>, vector<1x16x16xbf16>
    %40 = vector.shape_cast %39 : vector<1x16x16xbf16> to vector<16x16xbf16>
    %41 = vector.extract_strided_slice %4 {offsets = [0, 37], sizes = [16, 384], strides = [1, 1]} : vector<16x512xbf16> to vector<16x384xbf16>
    %cst_24 = arith.constant dense<0.000000e+00> : vector<16x384xf32>
    %42 = tpu.matmul %40, %41, %cst_24 {dimension_numbers = #tpu.dot_dimension_numbers<[1], [0], [0], [1], [0, 0, 1, 1], [], []>} : vector<16x16xbf16>, vector<16x384xbf16>, vector<16x384xf32> -> vector<16x384xf32>
    %43 = arith.addf %38, %42 : vector<16x384xf32>
    %c8 = arith.constant 8 : index
    %c0_25 = arith.constant 0 : index
    %c0_26 = arith.constant 0 : index
    %44 = vector.load %arg3[%c8, %c0_25, %c0_26] : memref<9x16x16xbf16, #tpu.memory_space<vmem>>, vector<1x16x16xbf16>
    %45 = vector.shape_cast %44 : vector<1x16x16xbf16> to vector<16x16xbf16>
    %46 = vector.extract_strided_slice %4 {offsets = [0, 38], sizes = [16, 384], strides = [1, 1]} : vector<16x512xbf16> to vector<16x384xbf16>
    %cst_27 = arith.constant dense<0.000000e+00> : vector<16x384xf32>
    %47 = tpu.matmul %45, %46, %cst_27 {dimension_numbers = #tpu.dot_dimension_numbers<[1], [0], [0], [1], [0, 0, 1, 1], [], []>} : vector<16x16xbf16>, vector<16x384xbf16>, vector<16x384xf32> -> vector<16x384xf32>
    %48 = arith.addf %43, %47 : vector<16x384xf32>
    %c0_28 = arith.constant 0 : index
    %c0_29 = arith.constant 0 : index
    %49 = vector.load %arg4[%c0_28, %c0_29] : memref<16x1xf32, #tpu.memory_space<vmem>>, vector<16x1xf32>
    %50 = vector.broadcast %49 : vector<16x1xf32> to vector<16x384xf32>
    %51 = arith.mulf %48, %50 : vector<16x384xf32>
    %c0_30 = arith.constant 0 : index
    %c0_31 = arith.constant 0 : index
    %52 = vector.load %arg5[%c0_30, %c0_31] : memref<16x1xf32, #tpu.memory_space<vmem>>, vector<16x1xf32>
    %53 = vector.broadcast %52 : vector<16x1xf32> to vector<16x384xf32>
    %54 = arith.addf %51, %53 : vector<16x384xf32>
    %55 = arith.negf %54 : vector<16x384xf32>
    %56 = math.exp %55 : vector<16x384xf32>
    %cst_32 = arith.constant 1.000000e+00 : f32
    %57 = vector.broadcast %cst_32 : f32 to vector<16x384xf32>
    %58 = arith.addf %57, %56 : vector<16x384xf32>
    %59 = arith.divf %57, %58 : vector<16x384xf32>
    %60 = arith.mulf %54, %59 : vector<16x384xf32>
    %c0_33 = arith.constant 0 : index
    %c0_34 = arith.constant 0 : index
    %c0_35 = arith.constant 0 : index
    %61 = vector.load %arg6[%c0_33, %c0_34, %c0_35] : memref<1x16x384xf32, #tpu.memory_space<vmem>>, vector<1x16x384xf32>
    %62 = vector.shape_cast %61 : vector<1x16x384xf32> to vector<16x384xf32>
    %63 = vector.shape_cast %60 : vector<16x384xf32> to vector<1x16x384xf32>
    tpu.vector_store %arg6[%c0_33, %c0_34, %c0_35], %63 {strides = array<i32>} : memref<1x16x384xf32, #tpu.memory_space<vmem>>, vector<1x16x384xf32>,
    return
  }
  func.func @transform_0(%arg0: i32, %arg1: i32) -> (i32, i32, i32) {
    %c0_i32 = arith.constant 0 : i32
    %c0_i32_0 = arith.constant 0 : i32
    %c0_i32_1 = arith.constant 0 : i32
    return %arg0, %c0_i32, %c0_i32_0 : i32, i32, i32
  }
  func.func @transform_1(%arg0: i32, %arg1: i32) -> (i32, i32, i32) {
    %c0_i32 = arith.constant 0 : i32
    %c0_i32_0 = arith.constant 0 : i32
    %c0_i32_1 = arith.constant 0 : i32
    %c0_i32_2 = arith.constant 0 : i32
    return %c0_i32, %c0_i32_0, %c0_i32_1 : i32, i32, i32
  }
  func.func @transform_2(%arg0: i32, %arg1: i32) -> (i32, i32) {
    %c0_i32 = arith.constant 0 : i32
    %c0_i32_0 = arith.constant 0 : i32
    %c0_i32_1 = arith.constant 0 : i32
    return %c0_i32, %c0_i32_0 : i32, i32
  }
  func.func @transform_3(%arg0: i32, %arg1: i32) -> (i32, i32) {
    %c0_i32 = arith.constant 0 : i32
    %c0_i32_0 = arith.constant 0 : i32
    %c0_i32_1 = arith.constant 0 : i32
    return %c0_i32, %c0_i32_0 : i32, i32
  }
  func.func @transform_4(%arg0: i32, %arg1: i32) -> (i32, i32, i32) {
    %c0_i32 = arith.constant 0 : i32
    %c0_i32_0 = arith.constant 0 : i32
    return %arg0, %c0_i32, %arg1 : i32, i32, i32
  }
}

module attributes {stable_mosaic.version = 11 : i64} {
  func.func @_fsda_kernel(%arg0: i32, %arg1: i32, %arg2: i32, %arg3: i32, %arg4: memref<1x1x16x256xf32, #tpu.memory_space<vmem>>, %arg5: memref<1x16x16xf32, #tpu.memory_space<vmem>>, %arg6: memref<1x16x1xf32, #tpu.memory_space<vmem>>, %arg7: memref<1x16x1xf32, #tpu.memory_space<vmem>>, %arg8: memref<1x16x1xf32, #tpu.memory_space<vmem>>, %arg9: memref<1x16x16xf32, #tpu.memory_space<vmem>>, %arg10: memref<1x16x1xf32, #tpu.memory_space<vmem>>, %arg11: memref<1x1x16x256xf32, #tpu.memory_space<vmem>>, %arg12: memref<16x1xf32, #tpu.memory_space<vmem>>, %arg13: memref<16x1xf32, #tpu.memory_space<vmem>>) attributes {dimension_semantics = [#tpu.dimension_semantics<parallel>, #tpu.dimension_semantics<parallel>, #tpu.dimension_semantics<arbitrary>, #tpu.dimension_semantics<arbitrary>], iteration_bounds = array<i64: 2, 2, 2, 1>, scalar_prefetch = 0 : i64, scratch_operands = 2 : i64, tpu.core_type = #tpu.core_type<tc>, window_params = [{transform_indices = @transform_0, window_bounds = array<i64: 1, 1, 16, 256>}, {transform_indices = @transform_1, window_bounds = array<i64: 1, 16, 16>}, {transform_indices = @transform_2, window_bounds = array<i64: 1, 16, 1>}, {transform_indices = @transform_3, window_bounds = array<i64: 1, 16, 1>}, {transform_indices = @transform_4, window_bounds = array<i64: 1, 16, 1>}, {transform_indices = @transform_5, window_bounds = array<i64: 1, 16, 16>}, {transform_indices = @transform_6, window_bounds = array<i64: 1, 16, 1>}, {transform_indices = @transform_7, window_bounds = array<i64: 1, 1, 16, 256>}]} {
    %c0 = arith.constant 0 : index
    %c0_0 = arith.constant 0 : index
    %c0_1 = arith.constant 0 : index
    %c0_2 = arith.constant 0 : index
    %0 = vector.load %arg4[%c0, %c0_0, %c0_1, %c0_2] : memref<1x1x16x256xf32, #tpu.memory_space<vmem>>, vector<1x1x16x256xf32>
    %1 = vector.shape_cast %0 : vector<1x1x16x256xf32> to vector<16x256xf32>
    %c0_3 = arith.constant 0 : index
    %c0_4 = arith.constant 0 : index
    %c0_5 = arith.constant 0 : index
    %2 = vector.load %arg5[%c0_3, %c0_4, %c0_5] : memref<1x16x16xf32, #tpu.memory_space<vmem>>, vector<1x16x16xf32>
    %3 = vector.shape_cast %2 : vector<1x16x16xf32> to vector<16x16xf32>
    %cst = arith.constant dense<0.000000e+00> : vector<16x256xf32>
    %4 = tpu.matmul %3, %1, %cst {dimension_numbers = #tpu.dot_dimension_numbers<[1], [0], [0], [1], [0, 0, 1, 1], [], []>} : vector<16x16xf32>, vector<16x256xf32>, vector<16x256xf32> -> vector<16x256xf32>
    %c0_6 = arith.constant 0 : index
    %c0_7 = arith.constant 0 : index
    %c0_8 = arith.constant 0 : index
    %5 = vector.load %arg6[%c0_6, %c0_7, %c0_8] : memref<1x16x1xf32, #tpu.memory_space<vmem>>, vector<1x16x1xf32>
    %6 = vector.shape_cast %5 : vector<1x16x1xf32> to vector<16x1xf32>
    %7 = vector.broadcast %6 : vector<16x1xf32> to vector<16x256xf32>
    %8 = arith.addf %4, %7 : vector<16x256xf32>
    %cst_9 = arith.constant 0.000000e+00 : f32
    %9 = vector.broadcast %cst_9 : f32 to vector<16x256xf32>
    %10 = arith.cmpf oge, %8, %9 : vector<16x256xf32>
    %cst_10 = arith.constant 1.000000e-01 : f32
    %11 = vector.broadcast %cst_10 : f32 to vector<16x256xf32>
    %12 = arith.mulf %11, %8 : vector<16x256xf32>
    %13 = arith.select %10, %8, %12 : vector<16x256xi1>, vector<16x256xf32>
    %c0_i32 = arith.constant 0 : i32
    %14 = arith.cmpi eq, %arg2, %c0_i32 : i32
    %c0_i32_11 = arith.constant 0 : i32
    %15 = arith.cmpi eq, %arg3, %c0_i32_11 : i32
    %16 = arith.andi %14, %15 : i1
    %17 = arith.extui %16 : i1 to i32
    %c0_i32_12 = arith.constant 0 : i32
    %18 = arith.cmpi ne, %17, %c0_i32_12 : i32
    scf.if %18 {
      %cst_19 = arith.constant 0.000000e+00 : f32
      %30 = vector.broadcast %cst_19 : f32 to vector<16x1xf32>
      %c0_20 = arith.constant 0 : index
      %c0_21 = arith.constant 0 : index
      %31 = vector.load %arg12[%c0_20, %c0_21] : memref<16x1xf32, #tpu.memory_space<vmem>>, vector<16x1xf32>
      tpu.vector_store %arg12[%c0_20, %c0_21], %30 {strides = array<i32>} : memref<16x1xf32, #tpu.memory_space<vmem>>, vector<16x1xf32>,
    } else {
    }
    %c0_i32_13 = arith.constant 0 : i32
    %19 = arith.cmpi eq, %arg2, %c0_i32_13 : i32
    %20 = arith.extui %19 : i1 to i32
    %c0_i32_14 = arith.constant 0 : i32
    %21 = arith.cmpi ne, %20, %c0_i32_14 : i32
    scf.if %21 {
      %c256_i32 = arith.constant 256 : i32
      %30 = arith.muli %arg3, %c256_i32 : i32
      %31 = tpu.iota {dimensions = array<i32: 1>} : vector<16x256xi32>
      %32 = vector.broadcast %30 : i32 to vector<16x256xi32>
      %33 = arith.addi %32, %31 : vector<16x256xi32>
      %c0_19 = arith.constant 0 : index
      %c0_20 = arith.constant 0 : index
      %34 = vector.load %arg12[%c0_19, %c0_20] : memref<16x1xf32, #tpu.memory_space<vmem>>, vector<16x1xf32>
      %c144_i32 = arith.constant 144 : i32
      %35 = vector.broadcast %c144_i32 : i32 to vector<16x256xi32>
      %36 = arith.cmpi slt, %33, %35 : vector<16x256xi32>
      %cst_21 = arith.constant 0.000000e+00 : f32
      %37 = vector.broadcast %cst_21 : f32 to vector<16x256xf32>
      %38 = arith.select %36, %13, %37 : vector<16x256xi1>, vector<16x256xf32>
      %cst_22 = arith.constant dense<0.000000e+00> : vector<16xf32>
      %39 = vector.multi_reduction <add>, %38, %cst_22 [1] : vector<16x256xf32> to vector<16xf32>
      %40 = vector.shape_cast %39 : vector<16xf32> to vector<16x1xf32>
      %41 = arith.addf %34, %40 : vector<16x1xf32>
      %c0_23 = arith.constant 0 : index
      %c0_24 = arith.constant 0 : index
      %42 = vector.load %arg12[%c0_23, %c0_24] : memref<16x1xf32, #tpu.memory_space<vmem>>, vector<16x1xf32>
      tpu.vector_store %arg12[%c0_23, %c0_24], %41 {strides = array<i32>} : memref<16x1xf32, #tpu.memory_space<vmem>>, vector<16x1xf32>,
    } else {
    }
    %c1_i32 = arith.constant 1 : i32
    %22 = arith.cmpi eq, %arg2, %c1_i32 : i32
    %c0_i32_15 = arith.constant 0 : i32
    %23 = arith.cmpi eq, %arg3, %c0_i32_15 : i32
    %24 = arith.andi %22, %23 : i1
    %25 = arith.extui %24 : i1 to i32
    %c0_i32_16 = arith.constant 0 : i32
    %26 = arith.cmpi ne, %25, %c0_i32_16 : i32
    scf.if %26 {
      %c0_19 = arith.constant 0 : index
      %c0_20 = arith.constant 0 : index
      %30 = vector.load %arg12[%c0_19, %c0_20] : memref<16x1xf32, #tpu.memory_space<vmem>>, vector<16x1xf32>
      %cst_21 = arith.constant 0.0069444445 : f32
      %31 = vector.broadcast %cst_21 : f32 to vector<16x1xf32>
      %32 = arith.mulf %30, %31 : vector<16x1xf32>
      %c0_22 = arith.constant 0 : index
      %c0_23 = arith.constant 0 : index
      %c0_24 = arith.constant 0 : index
      %33 = vector.load %arg7[%c0_22, %c0_23, %c0_24] : memref<1x16x1xf32, #tpu.memory_space<vmem>>, vector<1x16x1xf32>
      %34 = vector.shape_cast %33 : vector<1x16x1xf32> to vector<16x1xf32>
      %35 = arith.mulf %34, %32 : vector<16x1xf32>
      %cst_25 = arith.constant dense<0.000000e+00> : vector<1xf32>
      %36 = vector.multi_reduction <add>, %35, %cst_25 [0] : vector<16x1xf32> to vector<1xf32>
      %37 = vector.shape_cast %36 : vector<1xf32> to vector<1x1xf32>
      %cst_26 = arith.constant 0.000000e+00 : f32
      %38 = vector.broadcast %cst_26 : f32 to vector<1x1xf32>
      %39 = arith.maximumf %37, %38 : vector<1x1xf32>
      %c0_27 = arith.constant 0 : index
      %c0_28 = arith.constant 0 : index
      %c0_29 = arith.constant 0 : index
      %40 = vector.load %arg8[%c0_27, %c0_28, %c0_29] : memref<1x16x1xf32, #tpu.memory_space<vmem>>, vector<1x16x1xf32>
      %41 = vector.shape_cast %40 : vector<1x16x1xf32> to vector<16x1xf32>
      %42 = vector.broadcast %39 : vector<1x1xf32> to vector<16x1xf32>
      %43 = arith.mulf %41, %42 : vector<16x1xf32>
      %cst_30 = arith.constant dense<0.000000e+00> : vector<16xf32>
      %44 = vector.multi_reduction <add>, %43, %cst_30 [1] : vector<16x1xf32> to vector<16xf32>
      %45 = vector.shape_cast %44 : vector<16xf32> to vector<16x1xf32>
      %46 = arith.negf %45 : vector<16x1xf32>
      %47 = math.exp %46 : vector<16x1xf32>
      %cst_31 = arith.constant 1.000000e+00 : f32
      %48 = vector.broadcast %cst_31 : f32 to vector<16x1xf32>
      %49 = arith.addf %48, %47 : vector<16x1xf32>
      %50 = arith.divf %48, %49 : vector<16x1xf32>
      %c0_32 = arith.constant 0 : index
      %c0_33 = arith.constant 0 : index
      %51 = vector.load %arg13[%c0_32, %c0_33] : memref<16x1xf32, #tpu.memory_space<vmem>>, vector<16x1xf32>
      tpu.vector_store %arg13[%c0_32, %c0_33], %50 {strides = array<i32>} : memref<16x1xf32, #tpu.memory_space<vmem>>, vector<16x1xf32>,
    } else {
    }
    %c1_i32_17 = arith.constant 1 : i32
    %27 = arith.cmpi eq, %arg2, %c1_i32_17 : i32
    %28 = arith.extui %27 : i1 to i32
    %c0_i32_18 = arith.constant 0 : i32
    %29 = arith.cmpi ne, %28, %c0_i32_18 : i32
    scf.if %29 {
      %c0_19 = arith.constant 0 : index
      %c0_20 = arith.constant 0 : index
      %c0_21 = arith.constant 0 : index
      %30 = vector.load %arg9[%c0_19, %c0_20, %c0_21] : memref<1x16x16xf32, #tpu.memory_space<vmem>>, vector<1x16x16xf32>
      %31 = vector.shape_cast %30 : vector<1x16x16xf32> to vector<16x16xf32>
      %c0_22 = arith.constant 0 : index
      %c0_23 = arith.constant 0 : index
      %32 = vector.load %arg13[%c0_22, %c0_23] : memref<16x1xf32, #tpu.memory_space<vmem>>, vector<16x1xf32>
      %33 = vector.broadcast %32 : vector<16x1xf32> to vector<16x256xf32>
      %34 = arith.mulf %13, %33 : vector<16x256xf32>
      %cst_24 = arith.constant dense<0.000000e+00> : vector<16x256xf32>
      %35 = tpu.matmul %31, %34, %cst_24 {dimension_numbers = #tpu.dot_dimension_numbers<[1], [0], [0], [1], [0, 0, 1, 1], [], []>} : vector<16x16xf32>, vector<16x256xf32>, vector<16x256xf32> -> vector<16x256xf32>
      %c0_25 = arith.constant 0 : index
      %c0_26 = arith.constant 0 : index
      %c0_27 = arith.constant 0 : index
      %36 = vector.load %arg10[%c0_25, %c0_26, %c0_27] : memref<1x16x1xf32, #tpu.memory_space<vmem>>, vector<1x16x1xf32>
      %37 = vector.shape_cast %36 : vector<1x16x1xf32> to vector<16x1xf32>
      %38 = vector.broadcast %37 : vector<16x1xf32> to vector<16x256xf32>
      %39 = arith.addf %35, %38 : vector<16x256xf32>
      %40 = arith.addf %1, %39 : vector<16x256xf32>
      %c0_28 = arith.constant 0 : index
      %c0_29 = arith.constant 0 : index
      %c0_30 = arith.constant 0 : index
      %c0_31 = arith.constant 0 : index
      %41 = vector.load %arg11[%c0_28, %c0_29, %c0_30, %c0_31] : memref<1x1x16x256xf32, #tpu.memory_space<vmem>>, vector<1x1x16x256xf32>
      %42 = vector.shape_cast %41 : vector<1x1x16x256xf32> to vector<16x256xf32>
      %43 = vector.shape_cast %40 : vector<16x256xf32> to vector<1x1x16x256xf32>
      tpu.vector_store %arg11[%c0_28, %c0_29, %c0_30, %c0_31], %43 {strides = array<i32>} : memref<1x1x16x256xf32, #tpu.memory_space<vmem>>, vector<1x1x16x256xf32>,
    } else {
    }
    return
  }
  func.func @transform_0(%arg0: i32, %arg1: i32, %arg2: i32, %arg3: i32) -> (i32, i32, i32, i32) {
    %c0_i32 = arith.constant 0 : i32
    %c0_i32_0 = arith.constant 0 : i32
    return %arg0, %arg1, %c0_i32, %arg3 : i32, i32, i32, i32
  }
  func.func @transform_1(%arg0: i32, %arg1: i32, %arg2: i32, %arg3: i32) -> (i32, i32, i32) {
    %c0_i32 = arith.constant 0 : i32
    %c0_i32_0 = arith.constant 0 : i32
    %c0_i32_1 = arith.constant 0 : i32
    return %arg1, %c0_i32, %c0_i32_0 : i32, i32, i32
  }
  func.func @transform_2(%arg0: i32, %arg1: i32, %arg2: i32, %arg3: i32) -> (i32, i32, i32) {
    %c0_i32 = arith.constant 0 : i32
    %c0_i32_0 = arith.constant 0 : i32
    %c0_i32_1 = arith.constant 0 : i32
    return %arg1, %c0_i32, %c0_i32_0 : i32, i32, i32
  }
  func.func @transform_3(%arg0: i32, %arg1: i32, %arg2: i32, %arg3: i32) -> (i32, i32, i32) {
    %c0_i32 = arith.constant 0 : i32
    %c0_i32_0 = arith.constant 0 : i32
    %c0_i32_1 = arith.constant 0 : i32
    return %arg1, %c0_i32, %c0_i32_0 : i32, i32, i32
  }
  func.func @transform_4(%arg0: i32, %arg1: i32, %arg2: i32, %arg3: i32) -> (i32, i32, i32) {
    %c0_i32 = arith.constant 0 : i32
    %c0_i32_0 = arith.constant 0 : i32
    %c0_i32_1 = arith.constant 0 : i32
    return %arg1, %c0_i32, %c0_i32_0 : i32, i32, i32
  }
  func.func @transform_5(%arg0: i32, %arg1: i32, %arg2: i32, %arg3: i32) -> (i32, i32, i32) {
    %c0_i32 = arith.constant 0 : i32
    %c0_i32_0 = arith.constant 0 : i32
    %c0_i32_1 = arith.constant 0 : i32
    return %arg1, %c0_i32, %c0_i32_0 : i32, i32, i32
  }
  func.func @transform_6(%arg0: i32, %arg1: i32, %arg2: i32, %arg3: i32) -> (i32, i32, i32) {
    %c0_i32 = arith.constant 0 : i32
    %c0_i32_0 = arith.constant 0 : i32
    %c0_i32_1 = arith.constant 0 : i32
    return %arg1, %c0_i32, %c0_i32_0 : i32, i32, i32
  }
  func.func @transform_7(%arg0: i32, %arg1: i32, %arg2: i32, %arg3: i32) -> (i32, i32, i32, i32) {
    %0 = arith.muli %arg3, %arg2 : i32
    %c0_i32 = arith.constant 0 : i32
    %c0_i32_0 = arith.constant 0 : i32
    return %arg0, %arg1, %c0_i32, %0 : i32, i32, i32, i32
  }
}

</mosaic_0001>

<bundles_post_ra>
// kernel: _lambda_.2
= control target key start
LH: loop header
LB: loop body
LE: loop exit
PB: predicated region body
PF: predicated region fallthrough
CT: control target
= control target key end

     0   :  { %s1378_s15 = smov 0   ;;  %s1380_s16 = smov 0   ;;  %s1581_s0 = inlined_call_operand.vmem [shape: bf16[2,16,512], index: 0, kind: input, shape index: {}]   ;;  %s1582_s1 = inlined_call_operand.vmem [shape: bf16[9,16,16], index: 1, kind: input, shape index: {}]   ;;  %s1583_s2 = inlined_call_operand.vmem [shape: f32[16,1], index: 2, kind: input, shape index: {}]   ;;  %s1584_s3 = inlined_call_operand.vmem [shape: f32[16,1], index: 3, kind: input, shape index: {}]   ;;  %s1585_s4 = inlined_call_operand.vmem [shape: f32[2,16,384], index: 4, kind: output, shape index: {}]  }
   0x1   :  { %s1382_s17 = smov 0  }
   0x2 LB: > { %s26_s18 = sadd.s32 1, %s1338_s16  ;;  %p1138_p0 = scmp.ge.s32.totalorder %s1342_s17, 1  ;;  %s1342_s17 = sphi %s1382_s17, %s14_s17   ;;  %s1338_s16 = sphi %s1380_s16, %s1591_s16   ;;  %s1334_s15 = sphi %s1378_s15, %s1590_s15  }
   0x3   : > { %p28_p1 = scmp.ge.s32.totalorder %s26_s18, 2  ;;  %p176_p2 = scmp.lt.s32.totalorder %s1342_s17, 3 }
   0x5   : > { %s1593_s18 = smov (%p28_p1, %s26_s18), 0  ;;  %p177_p3 = pnand %p1138_p0, %p176_p2 }
   0x6   : > { %p206_p4 = scmp.lt.s32.totalorder (!%p177_p3), %s1334_s15, 1  ;;  %s1344_s23 = smov (!%p177_p3), 127  }
   0x7   : > { %180 = sbr.rel (%p177_p3) target bundleno = 420 (0x1a4), region = 36  ;;  %s1345_s24 = smov (!%p177_p3), 126  }
   0x8   : > { %s1346_s25 = smov (!%p177_p3), 110   ;;  %s1347_s26 = smov (!%p177_p3), 109  }
   0x9   : > { %s1348_s27 = smov (!%p177_p3), 108   ;;  %s1349_s28 = smov (!%p177_p3), 92  }
   0xa   : > { %s1350_s29 = smov (!%p177_p3), 91   ;;  %s1351_s30 = smov (!%p177_p3), 90  }
   0xc   : > { %s1595_s15 = smov (!%p206_p4, %s1334_s15), 1  ;;  %v1250_v12 = vld [vmem:[%s1582_s1] sm:$0xff]  ;;  %vm272_vm0 = vcmask 130048   ;;  %vm265_vm1 = vcmask 1039360   ;;  %vm387_vm2 = vcmask 1031168   ;;  %v1251_v22 = vld [vmem:[%s1582_s1 + $0x8] sm:$0xff] }
   0xd   : > { %s1245_s19 = sshll.u32 %s1595_s15, 5  ;;  %vm461_vm3 = vcmask 900096   ;;  %v1252_v30 = vld [vmem:[%s1582_s1 + $0x10] sm:$0xff]  ;;  %vm535_vm4 = vcmask 891904   ;;  %v1253_v40 = vld [vmem:[%s1582_s1 + $0x18] sm:$0xff]  ;;  %vm609_vm5 = vcmask 883712  }
   0xe   : > { %s210_s22 = scalar_lea.vmem %s1581_s0, %s1245_s19  ;;  %vm683_vm6 = vcmask 752640   ;;  %v1255_v52 = vld [vmem:[%s1582_s1 + $0x28] sm:$0xff]  ;;  %v1254_v57 = vld [vmem:[%s1582_s1 + $0x20] sm:$0xff]  ;;  %vm757_vm7 = vcmask 744448   ;;  %v1256_v63 = vld [vmem:[%s1582_s1 + $0x30] sm:$0xff]  ;;  %vm831_vm8 = vcmask 736256  }
   0xf   : > { %v1158_v0 = vld [vmem:[%s210_s22 + $0x8] sm:$0xf]  ;;  %v1249_v1 = vld [vmem:[%s210_s22 + $0x14] sm:$0xf0]  ;;  %v1150_v2 = vld [vmem:[%s210_s22] sm:$0xf] }
  0x10   : > { %v1402_v3 = vor.u32 %v1249_v1, %v1158_v0  ;;  %v1248_v4 = vld [vmem:[%s210_s22 + $0xc] sm:$0xf0]  ;;  %v1247_v6 = vld [vmem:[%s210_s22 + $0xc] sm:$0xf]  ;;  %v1160_v7 = vld [vmem:[%s210_s22 + $0x18] sm:$0xf0] }
  0x11   : > { %v1151_v5 = vor.u32 %v1248_v4, %v1150_v2  ;;  %v1246_v8 = vld [vmem:[%s210_s22 + $0x4] sm:$0xf]  ;;  %v1152_v9 = vld [vmem:[%s210_s22 + $0x10] sm:$0xf0]  ;;  %v1163_v10 = vor.u32 %v1247_v6, %v1160_v7  ;;  %s1259_s9 = smul.u32 48, %s1595_s15 }
  0x12   : > { %261 = vrot.lane.b32.xlu0 %v1402_v3, %s1344_s23  ;;  %v1155_v11 = vor.u32 %v1246_v8, %v1152_v9  ;;  %v907_v7 = vld [vmem:[%s1584_s3] sm:$0xff]  ;;  %v890_v8 = vld [vmem:[%s1583_s2 + $0x8] sm:$0xff]  ;;  %v1352_v9 = vmov 0  }
  0x13   : > { %257 = vrot.lane.b32.xlu1 %v1151_v5, %s1344_s23  ;;  %379 = vrot.lane.b32.xlu2 %v1151_v5, %s1345_s24  ;;  %s1542_s11 = scalar_lea.vmem %s1585_s4, %s1259_s9 }
  0x14   : > { %336 = vmatpush.bf16.msra.mxu3 %v1151_v5  ;;  %1295 = vset.pattern.permute.xlu1 %v1352_v9 }
  0x15   : > { %1294 = vset.pattern.permute.xlu0 %v1352_v9  ;;  %1293 = vset.pattern.permute.xlu2 %v1352_v9 }
  0x17   : > { %1171 = vmatmul.msk.bf16.vlgmr.msra.gmra.mxu3 %vm272_vm0, %v1250_v12 }
  0x1a   : > { %263 = vrot.lane.b32.xlu0 %v1163_v10, %s1344_s23 }
  0x1b   : > { %259 = vrot.lane.b32.xlu1 %v1155_v11, %s1344_s23  ;;  %381 = vrot.lane.b32.xlu2 %v1155_v11, %s1345_s24 }
  0x22   : > { %383 = vrot.lane.b32.xlu0 %v1402_v3, %s1345_s24 }
  0x23   : > { %455 = vrot.lane.b32.xlu1 %v1155_v11, %s1346_s25  ;;  %457 = vrot.lane.b32.xlu2 %v1402_v3, %s1346_s25 }
  0x2a   : > { %385 = vrot.lane.b32.xlu0 %v1163_v10, %s1345_s24 }
  0x2b   : > { %453 = vrot.lane.b32.xlu1 %v1151_v5, %s1346_s25  ;;  %459 = vrot.lane.b32.xlu2 %v1163_v10, %s1346_s25 }
  0x32   : > { %531 = vrot.lane.b32.xlu0 %v1402_v3, %s1347_s26 }
  0x33   : > { %533 = vrot.lane.b32.xlu1 %v1163_v10, %s1347_s26  ;;  %527 = vrot.lane.b32.xlu2 %v1151_v5, %s1347_s26 }
  0x3a   : > { %529 = vrot.lane.b32.xlu0 %v1155_v11, %s1347_s26 }
  0x3b   : > { %601 = vrot.lane.b32.xlu1 %v1151_v5, %s1348_s27  ;;  %603 = vrot.lane.b32.xlu2 %v1155_v11, %s1348_s27 }
  0x42   : > { %675 = vrot.lane.b32.xlu0 %v1151_v5, %s1349_s28 }
  0x43   : > { %677 = vrot.lane.b32.xlu1 %v1155_v11, %s1349_s28  ;;  %605 = vrot.lane.b32.xlu2 %v1402_v3, %s1348_s27 }
  0x4a   : > { %607 = vrot.lane.b32.xlu0 %v1163_v10, %s1348_s27 }
  0x4b   : > { %679 = vrot.lane.b32.xlu1 %v1402_v3, %s1349_s28  ;;  %751 = vrot.lane.b32.xlu2 %v1155_v11, %s1350_s29 }
  0x52   : > { %753 = vrot.lane.b32.xlu0 %v1402_v3, %s1350_s29 }
  0x53   : > { %681 = vrot.lane.b32.xlu1 %v1163_v10, %s1349_s28  ;;  %749 = vrot.lane.b32.xlu2 %v1151_v5, %s1350_s29 }
  0x5a   : > { %755 = vrot.lane.b32.xlu0 %v1163_v10, %s1350_s29 }
  0x5b   : > { %827 = vrot.lane.b32.xlu1 %v1402_v3, %s1351_s30  ;;  %829 = vrot.lane.b32.xlu2 %v1163_v10, %s1351_s30 }
  0x62   : > { %823 = vrot.lane.b32.xlu0 %v1151_v5, %s1351_s30 }
  0x63   : > { %825 = vrot.lane.b32.xlu1 %v1155_v11, %s1351_s30 }
  0x6a   : > { %898 = vperm.xlu0 %1294, %v890_v8  }
  0x6b   : > { %911 = vperm.xlu1 %1295, %v907_v7  }
  0x6d   : > { %v380_v13 = vpop.permute.xlu2 %379 }
  0x75   : > { %v382_v14 = vpop.permute.xlu2 %381 }
  0x76   : > { %v388_v21 = vsel %vm387_vm2, %v380_v13, %v382_v14 }
  0x7d   : > { %v458_v15 = vpop.permute.xlu2 %457 }
  0x84   : > { %v262_v16 = vpop.permute.xlu0 %261 }
  0x85   : > { %v258_v17 = vpop.permute.xlu1 %257  ;;  %v460_v23 = vpop.permute.xlu2 %459 }
  0x86   : > { %v464_v27 = vsel %vm461_vm3, %v458_v15, %v460_v23 }
  0x8c   : > { %v264_v18 = vpop.permute.xlu0 %263 }
  0x8d   : > { %v260_v19 = vpop.permute.xlu1 %259  ;;  %v268_v20 = vsel %vm265_vm1, %v262_v16, %v264_v18  ;;  %v528_v32 = vpop.permute.xlu2 %527 }
  0x8e   : > { %v266_v24 = vsel %vm265_vm1, %v258_v17, %v260_v19  ;;  %v267_v25 = vsel %vm265_vm1, %v260_v19, %v262_v16  ;;  %311 = vmatpush.bf16.msra.mxu2 %v268_v20  ;;  %v889_v16 = vld [vmem:[%s1583_s2] sm:$0xff]  ;;  %v908_v17 = vld [vmem:[%s1584_s3 + $0x8] sm:$0xff] }
  0x8f   : > { %283 = vmatpush.bf16.msra.mxu0 %v266_v24  ;;  %297 = vmatpush.bf16.msra.mxu1 %v267_v25 }
  0x90   : > { %893 = vperm.xlu2 %1293, %v889_v16  }
  0x91   : > { %1166 = vmatmul.msk.bf16.vlgmr.msra.gmra.mxu2 %vm272_vm0, %v1251_v22 }
  0x92   : > { %404 = vmatpush.bf16.msrb.mxu2 %v388_v21  ;;  %1164 = vmatmul.msk.bf16.vlgmr.msra.gmra.mxu0 %vm272_vm0, %v1251_v22 }
  0x93   : > { %350 = vmatpush.bf16.msrb.mxu0 %v1155_v11  ;;  %364 = vmatpush.bf16.msrb.mxu1 %v1402_v3  ;;  %v1257_v11 = vld [vmem:[%s1582_s1 + $0x38] sm:$0xff] }
  0x94   : > { %1165 = vmatmul.msk.bf16.vlgmr.msra.gmra.mxu1 %vm272_vm0, %v1251_v22  ;;  %v384_v26 = vpop.permute.xlu0 %383 }
  0x95   : > { %v456_v28 = vpop.permute.xlu1 %455  ;;  %v389_v29 = vsel %vm387_vm2, %v382_v14, %v384_v26  ;;  %v604_v37 = vpop.permute.xlu2 %603 }
  0x96   : > { %418 = vmatpush.bf16.msrb.mxu3 %v389_v29  ;;  %v463_v31 = vsel %vm461_vm3, %v456_v28, %v458_v15  ;;  %v1258_v15 = vld [vmem:[%s1582_s1 + $0x40] sm:$0xff] }
  0x97   : > { %492 = vmatpush.bf16.msra.mxu2 %v463_v31 }
  0x98   : > { %916 = vperm.xlu2 %1293, %v908_v17  }
  0x99   : > { %1181 = vmatmul.msk.bf16.vlgmr.msrb.gmra.mxu3 %vm272_vm0, %v1252_v30 }
  0x9a   : > { %506 = vmatpush.bf16.msra.mxu3 %v464_v27  ;;  %v338_v18 = vpop.f32.mrf.mxu3 }
  0x9c   : > { %v386_v33 = vpop.permute.xlu0 %385 }
  0x9d   : > { %v390_v34 = vsel %vm387_vm2, %v384_v26, %v386_v33  ;;  %v454_v35 = vpop.permute.xlu1 %453  ;;  %v606_v42 = vpop.permute.xlu2 %605 }
  0x9e   : > { %v462_v36 = vsel %vm461_vm3, %v454_v35, %v456_v28  ;;  %432 = vmatpush.bf16.msra.mxu0 %v390_v34  ;;  %v611_v48 = vsel %vm609_vm5, %v604_v37, %v606_v42 }
  0x9f   : > { %478 = vmatpush.bf16.msra.mxu1 %v462_v36 }
  0xa1   : > { %1180 = vmatmul.msk.bf16.vlgmr.msrb.gmra.mxu2 %vm272_vm0, %v1252_v30 }
  0xa2   : > { %1172 = vmatmul.msk.bf16.vlgmr.msrb.gmra.mxu0 %vm272_vm0, %v1250_v12  ;;  %v340_v22 = vpop.f32.mrf.mxu3 }
  0xa4   : > { %1173 = vmatmul.msk.bf16.vlgmr.msrb.gmra.mxu1 %vm272_vm0, %v1250_v12  ;;  %v532_v38 = vpop.permute.xlu0 %531 }
  0xa5   : > { %v534_v39 = vpop.permute.xlu1 %533  ;;  %v752_v49 = vpop.permute.xlu2 %751 }
  0xa6   : > { %v538_v41 = vsel %vm535_vm4, %v532_v38, %v534_v39 }
  0xa7   : > { %580 = vmatpush.bf16.msrb.mxu2 %v538_v41 }
  0xa9   : > { %1191 = vmatmul.msk.bf16.vlgmr.msra.gmra.mxu3 %vm272_vm0, %v1253_v40 }
  0xac   : > { %v530_v43 = vpop.permute.xlu0 %529 }
  0xad   : > { %v537_v44 = vsel %vm535_vm4, %v530_v43, %v532_v38  ;;  %v536_v45 = vsel %vm535_vm4, %v528_v32, %v530_v43  ;;  %v602_v46 = vpop.permute.xlu1 %601  ;;  %v750_v58 = vpop.permute.xlu2 %749 }
  0xae   : > { %566 = vmatpush.bf16.msrb.mxu1 %v537_v44  ;;  %v610_v47 = vsel %vm609_vm5, %v602_v46, %v604_v37  ;;  %552 = vmatpush.bf16.msrb.mxu0 %v536_v45  ;;  %v758_v60 = vsel %vm757_vm7, %v750_v58, %v752_v49 }
  0xaf   : > { %626 = vmatpush.bf16.msrb.mxu3 %v610_v47 }
  0xb1   : > { %1190 = vmatmul.msk.bf16.vlgmr.msra.gmra.mxu2 %vm272_vm0, %v1253_v40 }
  0xb2   : > { %1182 = vmatmul.msk.bf16.vlgmr.msra.gmra.mxu0 %vm272_vm0, %v1252_v30 }
  0xb3   : > { %640 = vmatpush.bf16.msra.mxu0 %v611_v48 }
  0xb4   : > { %1189 = vmatmul.msk.bf16.vlgmr.msra.gmra.mxu1 %vm272_vm0, %v1253_v40  ;;  %v676_v50 = vpop.permute.xlu0 %675 }
  0xb5   : > { %v678_v51 = vpop.permute.xlu1 %677  ;;  %v830_v5 = vpop.permute.xlu2 %829 }
  0xb6   : > { %v684_v53 = vsel %vm683_vm6, %v676_v50, %v678_v51 }
  0xb7   : > { %700 = vmatpush.bf16.msra.mxu2 %v684_v53 }
  0xb9   : > { %1207 = vmatmul.msk.bf16.vlgmr.msrb.gmra.mxu3 %vm272_vm0, %v1255_v52 }
  0xbc   : > { %v608_v54 = vpop.permute.xlu0 %607 }
  0xbd   : > { %v612_v55 = vsel %vm609_vm5, %v606_v42, %v608_v54  ;;  %v680_v56 = vpop.permute.xlu1 %679 }
  0xbe   : > { %v685_v59 = vsel %vm683_vm6, %v678_v51, %v680_v56  ;;  %654 = vmatpush.bf16.msra.mxu1 %v612_v55 }
  0xbf   : > { %714 = vmatpush.bf16.msra.mxu3 %v685_v59 }
  0xc1   : > { %1200 = vmatmul.msk.bf16.vlgmr.msrb.gmra.mxu2 %vm272_vm0, %v1254_v57 }
  0xc2   : > { %1198 = vmatmul.msk.bf16.vlgmr.msrb.gmra.mxu0 %vm272_vm0, %v1254_v57 }
  0xc4   : > { %1199 = vmatmul.msk.bf16.vlgmr.msrb.gmra.mxu1 %vm272_vm0, %v1254_v57  ;;  %v754_v61 = vpop.permute.xlu0 %753 }
  0xc5   : > { %774 = vmatpush.bf16.msrb.mxu1 %v758_v60  ;;  %v759_v62 = vsel %vm757_vm7, %v752_v49, %v754_v61  ;;  %v682_v0 = vpop.permute.xlu1 %681 }
  0xc6   : > { %v686_v1 = vsel %vm683_vm6, %v680_v56, %v682_v0  ;;  %788 = vmatpush.bf16.msrb.mxu2 %v759_v62 }
  0xc7   : > { %728 = vmatpush.bf16.msrb.mxu0 %v686_v1 }
  0xc9   : > { %1217 = vmatmul.msk.bf16.vlgmr.msra.gmra.mxu3 %vm272_vm0, %v1256_v63 }
  0xcc   : > { %v756_v2 = vpop.permute.xlu0 %755 }
  0xcd   : > { %v760_v3 = vsel %vm757_vm7, %v754_v61, %v756_v2  ;;  %v828_v4 = vpop.permute.xlu1 %827 }
  0xce   : > { %802 = vmatpush.bf16.msrb.mxu3 %v760_v3  ;;  %v834_v6 = vsel %vm831_vm8, %v828_v4, %v830_v5 }
  0xd1   : > { %1216 = vmatmul.msk.bf16.vlgmr.msra.gmra.mxu2 %vm272_vm0, %v1256_v63 }
  0xd2   : > { %1208 = vmatmul.msk.bf16.vlgmr.msra.gmra.mxu0 %vm272_vm0, %v1255_v52  ;;  %876 = vmatpush.bf16.msra.mxu2 %v834_v6 }
  0xd4   : > { %1209 = vmatmul.msk.bf16.vlgmr.msra.gmra.mxu1 %vm272_vm0, %v1255_v52  ;;  %v824_v10 = vpop.permute.xlu0 %823 }
  0xd5   : > { %v826_v12 = vpop.permute.xlu1 %825 }
  0xd6   : > { %v833_v13 = vsel %vm831_vm8, %v826_v12, %v828_v4  ;;  %v832_v14 = vsel %vm831_vm8, %v824_v10, %v826_v12 }
  0xd7   : > { %862 = vmatpush.bf16.msra.mxu1 %v833_v13  ;;  %848 = vmatpush.bf16.msra.mxu0 %v832_v14 }
  0xd9   : > { %1227 = vmatmul.msk.bf16.vlgmr.msrb.gmra.mxu3 %vm272_vm0, %v1257_v11 }
  0xe1   : > { %1226 = vmatmul.msk.bf16.vlgmr.msrb.gmra.mxu2 %vm272_vm0, %v1257_v11 }
  0xe2   : > { %1218 = vmatmul.msk.bf16.vlgmr.msrb.gmra.mxu0 %vm272_vm0, %v1256_v63 }
  0xe4   : > { %1225 = vmatmul.msk.bf16.vlgmr.msrb.gmra.mxu1 %vm272_vm0, %v1257_v11 }
  0xf1   : > { %1236 = vmatmul.msk.bf16.vlgmr.msra.gmra.mxu2 %vm272_vm0, %v1258_v15 }
  0xf2   : > { %1234 = vmatmul.msk.bf16.vlgmr.msra.gmra.mxu0 %vm272_vm0, %v1258_v15 }
  0xf4   : > { %1235 = vmatmul.msk.bf16.vlgmr.msra.gmra.mxu1 %vm272_vm0, %v1258_v15 }
 0x10f   : > { %v285_v19 = vpop.f32.mrf.mxu0 }
 0x110   : > { %v339_v63 = vadd.f32 %v338_v18, %v285_v19 }
 0x111   : > { %v299_v20 = vpop.f32.mrf.mxu1 }
 0x114   : > { %v313_v21 = vpop.f32.mrf.mxu2 }
 0x117   : > { %v287_v23 = vpop.f32.mrf.mxu0 }
 0x118   : > { %v341_v11 = vadd.f32 %v340_v22, %v287_v23 }
 0x119   : > { %v301_v24 = vpop.f32.mrf.mxu1 }
 0x11c   : > { %v315_v25 = vpop.f32.mrf.mxu2  ;;  %v420_v26 = vpop.f32.mrf.mxu3 }
 0x11f   : > { %v352_v27 = vpop.f32.mrf.mxu0 }
 0x120   : > { %v353_v29 = vadd.f32 %v352_v27, %v299_v20 }
 0x121   : > { %v366_v28 = vpop.f32.mrf.mxu1 }
 0x122   : > { %v367_v30 = vadd.f32 %v366_v28, %v313_v21  ;;  %v440_v0 = vadd.f32 %v420_v26, %v353_v29 }
 0x124   : > { %v406_v31 = vpop.f32.mrf.mxu2  ;;  %v422_v36 = vpop.f32.mrf.mxu3 }
 0x125   : > { %v439_v1 = vadd.f32 %v406_v31, %v339_v63 }
 0x127   : > { %v354_v32 = vpop.f32.mrf.mxu0 }
 0x128   : > { %v355_v34 = vadd.f32 %v354_v32, %v301_v24  ;;  %v894_v32 = vpop.permute.xlu2 %893 }
 0x129   : > { %v368_v33 = vpop.f32.mrf.mxu1 }
 0x12a   : > { %v369_v35 = vadd.f32 %v368_v33, %v315_v25  ;;  %v443_v14 = vadd.f32 %v422_v36, %v355_v34 }
 0x12c   : > { %v408_v37 = vpop.f32.mrf.mxu2  ;;  %v508_v40 = vpop.f32.mrf.mxu3 }
 0x12d   : > { %v442_v15 = vadd.f32 %v408_v37, %v341_v11 }
 0x12f   : > { %v434_v38 = vpop.f32.mrf.mxu0 }
 0x130   : > { %v441_v6 = vadd.f32 %v434_v38, %v367_v30 }
 0x131   : > { %v480_v39 = vpop.f32.mrf.mxu1 }
 0x132   : > { %v513_v2 = vadd.f32 %v480_v39, %v439_v1  ;;  %v515_v13 = vadd.f32 %v508_v40, %v441_v6  ;;  %v912_v39 = vpop.permute.xlu1 %911 }
 0x134   : > { %v494_v41 = vpop.f32.mrf.mxu2  ;;  %v510_v44 = vpop.f32.mrf.mxu3 }
 0x135   : > { %v514_v3 = vadd.f32 %v494_v41, %v440_v0 }
 0x137   : > { %v436_v42 = vpop.f32.mrf.mxu0 }
 0x138   : > { %v444_v25 = vadd.f32 %v436_v42, %v369_v35 }
 0x139   : > { %v482_v43 = vpop.f32.mrf.mxu1 }
 0x13a   : > { %v516_v20 = vadd.f32 %v482_v43, %v442_v15  ;;  %v518_v38 = vadd.f32 %v510_v44, %v444_v25 }
 0x13c   : > { %v496_v45 = vpop.f32.mrf.mxu2  ;;  %v628_v49 = vpop.f32.mrf.mxu3 }
 0x13d   : > { %v517_v18 = vadd.f32 %v496_v45, %v443_v14 }
 0x13f   : > { %v554_v46 = vpop.f32.mrf.mxu0 }
 0x140   : > { %v587_v7 = vadd.f32 %v554_v46, %v513_v2 }
 0x141   : > { %v568_v47 = vpop.f32.mrf.mxu1 }
 0x142   : > { %v588_v8 = vadd.f32 %v568_v47, %v514_v3  ;;  %v661_v16 = vadd.f32 %v628_v49, %v587_v7 }
 0x144   : > { %v582_v48 = vpop.f32.mrf.mxu2  ;;  %v630_v55 = vpop.f32.mrf.mxu3 }
 0x145   : > { %v589_v17 = vadd.f32 %v582_v48, %v515_v13 }
 0x147   : > { %v556_v50 = vpop.f32.mrf.mxu0 }
 0x148   : > { %v590_v27 = vadd.f32 %v556_v50, %v516_v20 }
 0x149   : > { %v570_v51 = vpop.f32.mrf.mxu1 }
 0x14a   : > { %v591_v28 = vadd.f32 %v570_v51, %v517_v18  ;;  %v664_v40 = vadd.f32 %v630_v55, %v590_v27  ;;  %v899_v55 = vpop.permute.xlu0 %898 }
 0x14c   : > { %v584_v52 = vpop.f32.mrf.mxu2  ;;  %v716_v59 = vpop.f32.mrf.mxu3 }
 0x14d   : > { %v592_v45 = vadd.f32 %v584_v52, %v518_v38 }
 0x14f   : > { %v642_v53 = vpop.f32.mrf.mxu0 }
 0x150   : > { %v662_v12 = vadd.f32 %v642_v53, %v588_v8 }
 0x151   : > { %v656_v54 = vpop.f32.mrf.mxu1 }
 0x152   : > { %v736_v19 = vadd.f32 %v716_v59, %v662_v12  ;;  %v663_v26 = vadd.f32 %v656_v54, %v589_v17 }
 0x154   : > { %v702_v56 = vpop.f32.mrf.mxu2  ;;  %v718_v4 = vpop.f32.mrf.mxu3 }
 0x155   : > { %v735_v21 = vadd.f32 %v702_v56, %v661_v16 }
 0x157   : > { %v644_v57 = vpop.f32.mrf.mxu0 }
 0x158   : > { %v665_v34 = vadd.f32 %v644_v57, %v591_v28 }
 0x159   : > { %v658_v58 = vpop.f32.mrf.mxu1 }
 0x15a   : > { %v739_v42 = vadd.f32 %v718_v4, %v665_v34  ;;  %v666_v50 = vadd.f32 %v658_v58, %v592_v45  ;;  %v917_v4 = vpop.permute.xlu2 %916 }
 0x15c   : > { %v704_v60 = vpop.f32.mrf.mxu2  ;;  %v804_v30 = vpop.f32.mrf.mxu3 }
 0x15d   : > { %v738_v46 = vadd.f32 %v704_v60, %v664_v40 }
 0x15f   : > { %v730_v61 = vpop.f32.mrf.mxu0 }
 0x160   : > { %v737_v22 = vadd.f32 %v730_v61, %v663_v26 }
 0x161   : > { %v776_v62 = vpop.f32.mrf.mxu1 }
 0x162   : > { %v809_v29 = vadd.f32 %v776_v62, %v735_v21  ;;  %v811_v35 = vadd.f32 %v804_v30, %v737_v22 }
 0x164   : > { %v790_v5 = vpop.f32.mrf.mxu2  ;;  %v806_v62 = vpop.f32.mrf.mxu3 }
 0x165   : > { %v810_v31 = vadd.f32 %v790_v5, %v736_v19 }
 0x167   : > { %v732_v9 = vpop.f32.mrf.mxu0 }
 0x168   : > { %v740_v57 = vadd.f32 %v732_v9, %v666_v50 }
 0x169   : > { %v778_v10 = vpop.f32.mrf.mxu1 }
 0x16a   : > { %v812_v53 = vadd.f32 %v778_v10, %v738_v46  ;;  %v814_v2 = vadd.f32 %v806_v62, %v740_v57 }
 0x16c   : > { %v792_v24 = vpop.f32.mrf.mxu2 }
 0x16d   : > { %v813_v54 = vadd.f32 %v792_v24, %v739_v42 }
 0x16f   : > { %v850_v23 = vpop.f32.mrf.mxu0 }
 0x170   : > { %v883_v36 = vadd.f32 %v850_v23, %v809_v29 }
 0x171   : > { %v864_v33 = vpop.f32.mrf.mxu1 }
 0x172   : > { %v884_v37 = vadd.f32 %v864_v33, %v810_v31  ;;  %v901_v41 = vmul.f32 %v894_v32, %v883_v36 }
 0x174   : > { %v902_v43 = vmul.f32 %v894_v32, %v884_v37  ;;  %v1494_v47 = vadd.f32 %v912_v39, %v901_v41  ;;  %v878_v49 = vpop.f32.mrf.mxu2 }
 0x175   : > { %v885_v51 = vadd.f32 %v878_v49, %v811_v35 }
 0x176   : > { %v1496_v48 = vadd.f32 %v912_v39, %v902_v43  ;;  %v1237_v56 = vmul.f32 -1.442695, %v1494_v47 }
 0x177   : > { %v903_v59 = vmul.f32 %v894_v32, %v885_v51  ;;  %v852_v52 = vpop.f32.mrf.mxu0 }
 0x178   : > { %v1238_v44 = vmul.f32 -1.442695, %v1496_v48  ;;  %1296 = vpow2.f32 %v1237_v56  ;;  %v886_v60 = vadd.f32 %v852_v52, %v812_v53 }
 0x179   : > { %v866_v61 = vpop.f32.mrf.mxu1  ;;  %v1500_v0 = vadd.f32 %v912_v39, %v903_v59 }
 0x17a   : > { %v887_v63 = vadd.f32 %v866_v61, %v813_v54  ;;  %1298 = vpow2.f32 %v1238_v44  ;;  %v904_v58 = vmul.f32 %v899_v55, %v886_v60 }
 0x17b   : > { %v1239_v3 = vmul.f32 -1.442695, %v1500_v0 }
 0x17c   : > { %v905_v1 = vmul.f32 %v899_v55, %v887_v63  ;;  %v1503_v5 = vadd.f32 %v917_v4, %v904_v58  ;;  %v880_v7 = vpop.f32.mrf.mxu2 }
 0x17d   : > { %1300 = vpow2.f32 %v1239_v3  ;;  %v888_v8 = vadd.f32 %v880_v7, %v814_v2 }
 0x17e   : > { %v1505_v6 = vadd.f32 %v917_v4, %v905_v1  ;;  %v1297_v9 = vpop.eup %1296  ;;  %v1240_v10 = vmul.f32 -1.442695, %v1503_v5 }
 0x17f   : > { %v943_v12 = vadd.f32 1.0, %v1297_v9  ;;  %v906_v14 = vmul.f32 %v899_v55, %v888_v8 }
 0x180   : > { %v1299_v11 = vpop.eup %1298  ;;  %v1241_v13 = vmul.f32 -1.442695, %v1505_v6  ;;  %1302 = vpow2.f32 %v1240_v10 }
 0x181   : > { %v944_v15 = vadd.f32 1.0, %v1299_v11  ;;  %1304 = vrcp.f32 %v943_v12  ;;  %v1509_v17 = vadd.f32 %v917_v4, %v906_v14  ;;  %v958_v28 = vand.u32 2147483647, %v943_v12 }
 0x182   : > { %v960_v31 = vand.u32 2147483648, %v943_v12  ;;  %vm954_vm9 = vweird.f32 %v943_v12 }
 0x183   : > { %1306 = vrcp.f32 %v944_v15  ;;  %v1301_v16 = vpop.eup %1300  ;;  %v1242_v18 = vmul.f32 -1.442695, %v1509_v17  ;;  %v973_v32 = vand.u32 2147483647, %v944_v15  ;;  %v975_v33 = vand.u32 2147483648, %v944_v15 }
 0x184   : > { %1308 = vpow2.f32 %v1241_v13  ;;  %v1511_v20 = vadd.f32 1.0, %v1301_v16  ;;  %vm969_vm11 = vweird.f32 %v944_v15  ;;  %vm1522_vm12 = vcmp.eq.f32.partialorder %v958_v28, 8.507059e+37 }
 0x185   : > { %v961_v43 = vor.u32 1.1754944e-38, %v960_v31  ;;  %vm1527_vm14 = vcmp.eq.f32.partialorder %v973_v32, 8.507059e+37  ;;  %v976_v49 = vor.u32 1.1754944e-38, %v975_v33 }
 0x186   : > { %v1303_v19 = vpop.eup %1302  ;;  %1310 = vrcp.f32 %v1511_v20  ;;  %v988_v51 = vand.u32 2147483647, %v1511_v20  ;;  %v990_v54 = vand.u32 2147483648, %v1511_v20  ;;  %vm984_vm2 = vweird.f32 %v1511_v20 }
 0x187   : > { %v1305_v21 = vpop.eup %1304  ;;  %v1515_v24 = vadd.f32 1.0, %v1303_v19  ;;  %1312 = vpow2.f32 %v1242_v18 }
 0x188   : > { %v950_v26 = vmul.f32 %v1305_v21, %v943_v12  ;;  %vm955_vm10 = vweird.f32 %v1305_v21  ;;  %v991_v2 = vor.u32 1.1754944e-38, %v990_v54  ;;  %vm989_vm5 = vcmp.eq.f32.partialorder %v988_v51, 8.507059e+37 }
 0x189   : > { %v1307_v25 = vpop.eup %1306  ;;  %1314 = vrcp.f32 %v1515_v24  ;;  %vm956_vm15 = vmor %vm954_vm9, %vm955_vm10  ;;  %v1005_v44 = vand.u32 2147483648, %v1515_v24  ;;  %v1003_v4 = vand.u32 2147483647, %v1515_v24  ;;  %vm999_vm6 = vweird.f32 %v1515_v24 }
 0x18a   : > { %v1309_v27 = vpop.eup %1308  ;;  %v965_v29 = vmul.f32 %v1307_v25, %v944_v15  ;;  %v951_v30 = vsub.f32 1.0, %v950_v26  ;;  %vm970_vm13 = vweird.f32 %v1307_v25 }
 0x18b   : > { %v1518_v22 = vadd.f32 1.0, %v1309_v27  ;;  %vm971_vm0 = vmor %vm969_vm11, %vm970_vm13  ;;  %v1006_v9 = vor.u32 1.1754944e-38, %v1005_v44  ;;  %vm1004_vm9 = vcmp.eq.f32.partialorder %v1003_v4, 8.507059e+37 }
 0x18c   : > { %v966_v23 = vsub.f32 1.0, %v965_v29  ;;  %v1311_v34 = vpop.eup %1310  ;;  %v952_v36 = vmul.f32 %v1305_v21, %v951_v30 }
 0x18d   : > { %1316 = vrcp.f32 %v1518_v22  ;;  %v1313_v37 = vpop.eup %1312  ;;  %v980_v40 = vmul.f32 %v1311_v34, %v1511_v20  ;;  %vm985_vm1 = vweird.f32 %v1311_v34  ;;  %v1020_v10 = vand.u32 2147483648, %v1518_v22 }
 0x18e   : > { %v967_v39 = vmul.f32 %v1307_v25, %v966_v23  ;;  %v953_v41 = vadd.f32 %v1305_v21, %v952_v36  ;;  %v1531_v35 = vadd.f32 1.0, %v1313_v37  ;;  %vm986_vm3 = vmor %vm984_vm2, %vm985_vm1  ;;  %v1018_v13 = vand.u32 2147483647, %v1518_v22 }
 0x18f   : > { %v1315_v42 = vpop.eup %1314  ;;  %v981_v50 = vsub.f32 1.0, %v980_v40  ;;  %vm1014_vm10 = vweird.f32 %v1518_v22  ;;  %v1021_v19 = vor.u32 1.1754944e-38, %v1020_v10 }
 0x190   : > { %v968_v46 = vadd.f32 %v1307_v25, %v967_v39  ;;  %v957_v53 = vsel %vm956_vm15, %v1305_v21, %v953_v41  ;;  %v995_v56 = vmul.f32 %v1315_v42, %v1515_v24  ;;  %1318 = vrcp.f32 %v1531_v35 }
 0x191   : > { %v962_v55 = vsel %vm1522_vm12, %v961_v43, %v957_v53  ;;  %v982_v59 = vmul.f32 %v1311_v34, %v981_v50  ;;  %vm1000_vm4 = vweird.f32 %v1315_v42  ;;  %vm1019_vm12 = vcmp.eq.f32.partialorder %v1018_v13, 8.507059e+37 }
 0x192   : > { %v972_v57 = vsel %vm971_vm0, %v1307_v25, %v968_v46  ;;  %v1039_v62 = vmul.f32 %v962_v55, %v1494_v47  ;;  %v996_v60 = vsub.f32 1.0, %v995_v56  ;;  %vm1001_vm7 = vmor %vm999_vm6, %vm1000_vm4  ;;  %v1035_v26 = vand.u32 2147483648, %v1531_v35 }
 0x193   : > { %v1317_v52 = vpop.eup %1316  ;;  %v977_v61 = vsel %vm1527_vm14, %v976_v49, %v972_v57  ;;  %v983_v58 = vadd.f32 %v1311_v34, %v982_v59  ;;  %v1033_v29 = vand.u32 2147483647, %v1531_v35  ;;  %vm1029_vm14 = vweird.f32 %v1531_v35 }
 0x194   : > { %v1040_v63 = vmul.f32 %v977_v61, %v1496_v48  ;;  %v1010_v1 = vmul.f32 %v1317_v52, %v1518_v22  ;;  %1045 = vst [vmem:[%s1542_s11] sm:$0xff] %v1039_v62  ;;  %v997_v3 = vmul.f32 %v1315_v42, %v996_v60  ;;  %vm1015_vm8 = vweird.f32 %v1317_v52 }
 0x195   : > { %v987_v7 = vsel %vm986_vm3, %v1311_v34, %v983_v58  ;;  %vm1016_vm11 = vmor %vm1014_vm10, %vm1015_vm8  ;;  %vm1034_vm0 = vcmp.eq.f32.partialorder %v1033_v29, 8.507059e+37 }
 0x196   : > { %1046 = vst [vmem:[%s1542_s11 + $0x8] sm:$0xff] %v1040_v63  ;;  %v1011_v47 = vsub.f32 1.0, %v1010_v1  ;;  %v992_v48 = vsel %vm989_vm5, %v991_v2, %v987_v7  ;;  %v998_v8 = vadd.f32 %v1315_v42, %v997_v3  ;;  %v1319_v14 = vpop.eup %1318 }
 0x197   : > { %v1041_v11 = vmul.f32 %v992_v48, %v1500_v0  ;;  %v1025_v18 = vmul.f32 %v1319_v14, %v1531_v35  ;;  %vm1030_vm13 = vweird.f32 %v1319_v14 }
 0x198   : > { %v1012_v12 = vmul.f32 %v1317_v52, %v1011_v47  ;;  %v1002_v15 = vsel %vm1001_vm7, %v1315_v42, %v998_v8  ;;  %vm1031_vm15 = vmor %vm1029_vm14, %vm1030_vm13 }
 0x199   : > { %1047 = vst [vmem:[%s1542_s11 + $0x10] sm:$0xff] %v1041_v11  ;;  %v1007_v16 = vsel %vm1004_vm9, %v1006_v9, %v1002_v15  ;;  %v1026_v24 = vsub.f32 1.0, %v1025_v18 }
 0x19a   : > { %v1013_v20 = vadd.f32 %v1317_v52, %v1012_v12  ;;  %v1042_v0 = vmul.f32 %v1007_v16, %v1503_v5  ;;  %v1036_v5 = vor.u32 1.1754944e-38, %v1035_v26 }
 0x19b   : > { %v1027_v28 = vmul.f32 %v1319_v14, %v1026_v24 }
 0x19c   : > { %v1017_v21 = vsel %vm1016_vm11, %v1317_v52, %v1013_v20  ;;  %1048 = vst [vmem:[%s1542_s11 + $0x18] sm:$0xff] %v1042_v0 }
 0x19d   : > { %v1022_v25 = vsel %vm1019_vm12, %v1021_v19, %v1017_v21  ;;  %v1028_v30 = vadd.f32 %v1319_v14, %v1027_v28 }
 0x19e   : > { %v1043_v27 = vmul.f32 %v1022_v25, %v1505_v6 }
 0x19f   : > { %v1032_v31 = vsel %vm1031_vm15, %v1319_v14, %v1028_v30 }
 0x1a0   : > { %1049 = vst [vmem:[%s1542_s11 + $0x20] sm:$0xff] %v1043_v27  ;;  %v1037_v32 = vsel %vm1034_vm0, %v1036_v5, %v1032_v31 }
 0x1a1   : > { %v1044_v22 = vmul.f32 %v1037_v32, %v1509_v17 }
 0x1a3   : > { %1050 = vst [vmem:[%s1542_s11 + $0x28] sm:$0xff] %v1044_v22 }
 0x1a4 PF: > { %s14_s17 = sadd.s32 1, %s1342_s17   ;;  %s1590_s15 = smov %s1338_s16 }
 0x1a5   : > { %p11_p5 = scmp.ge.s32.totalorder %s14_s17, 4   ;;  %s1591_s16 = smov %s1593_s18 }
 0x1a7   :  { %13 = sbr.rel (!%p11_p5) target bundleno = 2 (0x2), region = 75 }

// kernel: _lambda_.3
= control target key start
LH: loop header
LB: loop body
LE: loop exit
PB: predicated region body
PF: predicated region fallthrough
CT: control target
= control target key end

     0   :  { %s1185_s24 = smov 0   ;;  %s1187_s25 = smov 0   ;;  %s1350_s0 = inlined_call_operand.vmem [shape: f32[2,2,16,256], index: 0, kind: input, shape index: {}]   ;;  %s1351_s1 = inlined_call_operand.vmem [shape: f32[2,16,16], index: 1, kind: input, shape index: {}]   ;;  %s1352_s2 = inlined_call_operand.vmem [shape: f32[2,16,1], index: 2, kind: input, shape index: {}]   ;;  %s1353_s3 = inlined_call_operand.vmem [shape: f32[2,16,1], index: 3, kind: input, shape index: {}]   ;;  %s1354_s4 = inlined_call_operand.vmem [shape: f32[2,16,1], index: 4, kind: input, shape index: {}]   ;;  %s1355_s5 = inlined_call_operand.vmem [shape: f32[2,16,16], index: 5, kind: input, shape index: {}]   ;;  %s1356_s6 = inlined_call_operand.vmem [shape: f32[2,16,1], index: 6, kind: input, shape index: {}]   ;;  %s1357_s7 = inlined_call_operand.vmem [shape: f32[2,2,16,256], index: 7, kind: output, shape index: {}]  }
   0x1   :  { %s1189_s26 = smov 0   ;;  %s1191_s27 = smov 0  }
   0x2   :  { %s1193_s28 = smov 0   ;;  %s1195_s29 = smov 0  }
   0x3   :  { %s1197_s30 = smov 0  }
   0x4 LB: > { %s35_s8 = sadd.s32 1, %s1128_s27  ;;  %s39_s9 = sadd.s32 1, %s1132_s28  ;;  %s1140_s30 = sphi %s1197_s30, %s17_s30   ;;  %s1136_s29 = sphi %s1195_s29, %s1367_s29   ;;  %s1132_s28 = sphi %s1193_s28, %s1366_s28   ;;  %s1128_s27 = sphi %s1191_s27, %s1365_s27   ;;  %s1124_s26 = sphi %s1189_s26, %s1364_s26   ;;  %s1120_s25 = sphi %s1187_s25, %s1363_s25   ;;  %s1116_s24 = sphi %s1185_s24, %s1362_s24  }
   0x5   : > { %p37_p0 = scmp.ge.s32.totalorder %s35_s8, 2  ;;  %p965_p1 = scmp.ge.s32.totalorder %s1140_s30, 1 }
   0x6   : > { %p342_p2 = scmp.lt.s32.totalorder %s1140_s30, 9  ;;  %s43_s10 = sadd.s32 1, %s1136_s29 }
   0x7   : > { %s1369_s8 = smov (%p37_p0, %s35_s8), 0  ;;  %s1371_s9 = smov (!%p37_p0, %s39_s9), %s1132_s28 }
   0x8   : > { %p343_p3 = pnand %p965_p1, %p342_p2  ;;  %p41_p4 = scmp.ge.s32.totalorder %s1371_s9, 2 }
   0x9   : > { %p422_p6 = scmp.lt.s32.totalorder (!%p343_p3), %s1124_s26, 1  ;;  %p424_p7 = scmp.lt.s32.totalorder (!%p343_p3), %s1120_s25, 1 }
   0xa   : > { %s1373_s9 = smov (%p41_p4, %s1371_s9), 0  ;;  %s1375_s10 = smov (!%p41_p4, %s43_s10), %s1136_s29 }
   0xb   : > { %1358 = sst [smem:[#allocation4_spill]] %s1373_s9  ;;  %p45_p5 = scmp.ge.s32.totalorder %s1375_s10, 2 }
   0xc   : > { %346 = sbr.rel (%p343_p3) target bundleno = 643 (0x283), region = 48  ;;  %p564_p8 = scmp.eq.s32.totalorder (!%p343_p3), %s1116_s24, 0 }
   0xd   : > { %s1377_s10 = smov (%p45_p5, %s1375_s10), 0 }
   0xe   : > { %1359 = sst [smem:[#allocation5_spill]] %s1377_s10 }
  0x11   : > { %v1142_v0 = vmov 0   ;;  %s1379_s26 = smov (!%p422_p6, %s1124_s26), 1  ;;  %s1381_s25 = smov (!%p424_p7, %s1120_s25), 1  ;;  %vm499_vm0 = vcmask 130048   ;;  %vm570_vm5 = vcmask (%p564_p8), 7168   ;;  %v1143_v27 = vmov (%p564_p8), 0.0  }
  0x12   : > { %1075 = vset.pattern.permute.xlu0 %v1142_v0  ;;  %s967_s11 = sshll.u32 %s1379_s26, 3  ;;  %s966_s12 = sshll.u32 %s1381_s25, 2  ;;  %571 = vst.msk [vmem:[#allocation2] sm:$0xff] (%p564_p8), %vm570_vm5, %v1143_v27 }
  0x13   : > { %s1000_s13 = sshll.u32 %s1381_s25, 4  ;;  %s431_s14 = sadd.s32 %s967_s11, %s966_s12  ;;  %572 = vst.msk [vmem:[#allocation2 + $0x8] sm:$0xff] (%p564_p8), %vm570_vm5, %v1143_v27 }
  0x14   : > { %s1232_s17 = scalar_lea.vmem %s1353_s3, %s1000_s13  ;;  %s968_s18 = sshll.u32 %s431_s14, 3 }
  0x15   : > { %s1237_s21 = scalar_lea.vmem %s1354_s4, %s1000_s13  ;;  %s433_s10 = scalar_lea.vmem %s1350_s0, %s968_s18 }
  0x16   : > { %s1245_s25 = scalar_lea.vmem %s1355_s5, %s1000_s13  ;;  %s1250_s15 = scalar_lea.vmem %s1356_s6, %s1000_s13  ;;  %v1257_v1 = vld [vmem:[%s433_s10 + $0x10] sm:$0xff]  ;;  %v1259_v2 = vld [vmem:[%s433_s10 + $0x18] sm:$0xff]  ;;  %v1261_v3 = vld [vmem:[%s433_s10] sm:$0xff] }
  0x17   : > { %s1255_s19 = scalar_lea.vmem %s1357_s7, %s968_s18  ;;  %520 = vmatpush.msra.mxu0 %v1257_v1  ;;  %1008 = vmatpush.msra.mxu2 %v1257_v1  ;;  %v1265_v4 = vld [vmem:[%s433_s10 + $0x8] sm:$0xff]  ;;  %s439_s22 = scalar_lea.vmem %s1351_s1, %s1000_s13 }
  0x18   : > { %s444_s18 = scalar_lea.vmem %s1352_s2, %s1000_s13  ;;  %543 = vmatpush.msra.mxu1 %v1259_v2  ;;  %1010 = vmatpush.msra.mxu3 %v1259_v2  ;;  %v485_v5 = vld [vmem:[%s439_s22] sm:$0xff]  ;;  %v486_v6 = vld [vmem:[%s439_s22 + $0x8] sm:$0xff] }
  0x19   : > { %521 = vmatpush.msra.mxu0 %v1261_v3  ;;  %1009 = vmatpush.msra.mxu2 %v1261_v3  ;;  %v487_v7 = vld [vmem:[%s444_s18] sm:$0xff]  ;;  %v488_v8 = vld [vmem:[%s444_s18 + $0x8] sm:$0xff] }
  0x1a   : > { %544 = vmatpush.msra.mxu1 %v1265_v4  ;;  %1011 = vmatpush.msra.mxu3 %v1265_v4 }
  0x1b   : > { %984 = vmatmul.msk.f32.vlgmr.msra.gmra.mxu0 %vm499_vm0, %v485_v5  ;;  %985 = vmatmul.msk.f32.vlgmr.msra.gmra.mxu2 %vm499_vm0, %v486_v6 }
  0x1c   : > { %986 = vmatmul.msk.f32.vlgmr.msra.gmra.mxu1 %vm499_vm0, %v485_v5  ;;  %987 = vmatmul.msk.f32.vlgmr.msra.gmra.mxu3 %vm499_vm0, %v486_v6 }
  0x1d   : > { %491 = vperm.xlu0 %1075, %v487_v7  }
  0x25   : > { %496 = vperm.xlu0 %1075, %v488_v8  }
  0x8f   : > { %v492_v9 = vpop.permute.xlu0 %491 }
  0x97   : > { %v497_v17 = vpop.permute.xlu0 %496 }
  0x98   : > { %v523_v10 = vpop.f32.mrf.mxu0 }
  0x99   : > { %v524_v11 = vadd.f32 %v523_v10, %v492_v9  ;;  %v546_v12 = vpop.f32.mrf.mxu1 }
  0x9a   : > { %v547_v13 = vadd.f32 %v546_v12, %v492_v9 }
  0x9b   : > { %vm552_vm1 = vcmp.ge.f32.partialorder %v524_v11, 0.0  ;;  %v556_v14 = vmul.f32 0.1, %v524_v11 }
  0x9c   : > { %vm553_vm2 = vcmp.ge.f32.partialorder %v547_v13, 0.0  ;;  %v557_v15 = vmul.f32 0.1, %v547_v13 }
  0x9d   : > { %v1284_v16 = vsel %vm552_vm1, %v524_v11, %v556_v14 }
  0x9e   : > { %v1286_v18 = vsel %vm553_vm2, %v547_v13, %v557_v15  ;;  %v526_v19 = vpop.f32.mrf.mxu2 }
  0x9f   : > { %v527_v20 = vadd.f32 %v526_v19, %v497_v17  ;;  %v549_v21 = vpop.f32.mrf.mxu3 }
  0xa0   : > { %v550_v22 = vadd.f32 %v549_v21, %v497_v17  ;;  %569 = sbr.rel (!%p564_p8) target bundleno = 165 (0xa5), region = 52 }
  0xa1   : > { %vm554_vm3 = vcmp.ge.f32.partialorder %v527_v20, 0.0  ;;  %v558_v23 = vmul.f32 0.1, %v527_v20 }
  0xa2   : > { %vm555_vm4 = vcmp.ge.f32.partialorder %v550_v22, 0.0  ;;  %v559_v24 = vmul.f32 0.1, %v550_v22 }
  0xa3   : > { %v1288_v25 = vsel %vm554_vm3, %v527_v20, %v558_v23 }
  0xa4   : > { %v1290_v26 = vsel %vm555_vm4, %v550_v22, %v559_v24 }
  0xa5 PF: > { %p989_p9 = scmp.ne.s32.totalorder %s1116_s24, 0 }
  0xa7   : > { %575 = sbr.rel (%p989_p9) target bundleno = 309 (0x135), region = 56 }
  0xac   : > { %v577_v28 = vlaneseq  ;;  %v583_v35 = vld [vmem:[#allocation2] sm:$0xff]  ;;  %vm599_vm7 = vcmask 7168   ;;  %v584_v38 = vld [vmem:[#allocation2 + $0x8] sm:$0xff] }
  0xae   : > { %v578_v29 = vand.u32 127, %v577_v28 }
  0xb0   : > { %v579_v30 = vadd.s32 128, %v578_v29 }
  0xb2   : > { %vm586_vm6 = vcmp.lt.s32.totalorder %v579_v30, 144 }
  0xb3   : > { %v588_v31 = vsel %vm586_vm6, %v1286_v18, 0.0  ;;  %v590_v33 = vsel %vm586_vm6, %v1290_v26, 0.0 }
  0xb4   : > { %v591_v32 = vadd.f32 %v588_v31, %v1284_v16  ;;  %v594_v34 = vadd.f32 %v590_v33, %v1288_v25 }
  0xb6   : > { %592 = vadd.xlane.f32.xlu0 %v591_v32 }
  0xbe   : > { %595 = vadd.xlane.f32.xlu0 %v594_v34 }
 0x129   : > { %v593_v36 = vpop.xlane.xlu0 %592 }
 0x12a   : > { %v597_v37 = vadd.f32 %v593_v36, %v583_v35 }
 0x12c   : > { %600 = vst.msk [vmem:[#allocation2] sm:$0xff] %vm599_vm7, %v597_v37 }
 0x131   : > { %v596_v39 = vpop.xlane.xlu0 %595 }
 0x132   : > { %v598_v40 = vadd.f32 %v596_v39, %v584_v38 }
 0x134   : > { %601 = vst.msk [vmem:[#allocation2 + $0x8] sm:$0xff] %vm599_vm7, %v598_v40 }
 0x135 PF: > { %p602_p10 = scmp.eq.s32.totalorder %s1116_s24, 1 }
 0x136   : > { %v607_v41 = vld [vmem:[#allocation2] sm:$0xff] (%p602_p10)  ;;  %v612_v46 = vld [vmem:[%s1232_s17 + $0x8] sm:$0xff] (%p602_p10)  ;;  %vm615_vm8 = vcmask (%p602_p10), 7168  }
 0x137   : > { %606 = sbr.rel (!%p602_p10) target bundleno = 369 (0x171), region = 60  ;;  %v611_v43 = vld [vmem:[%s1232_s17] sm:$0xff] (%p602_p10)  ;;  %v609_v44 = vmul.f32 (%p602_p10), 0.0069444445, %v607_v41  ;;  %v627_v59 = vld [vmem:[%s1237_s21 + $0x8] sm:$0xff] (%p602_p10) }
 0x138   : > { %v626_v58 = vld [vmem:[%s1237_s21] sm:$0xff] (%p602_p10) }
 0x139   : > { %v613_v47 = vmul.f32 (%p602_p10), %v611_v43, %v609_v44 }
 0x13b   : > { %v608_v42 = vld [vmem:[#allocation2 + $0x8] sm:$0xff] (%p602_p10)  ;;  %v616_v49 = vsel (%p602_p10), %vm615_vm8, %v613_v47, 0.0 }
 0x13c   : > { %v610_v45 = vmul.f32 0.0069444445, %v608_v42 }
 0x13e   : > { %v614_v48 = vmul.f32 %v612_v46, %v610_v45 }
 0x140   : > { %v617_v50 = vsel %vm615_vm8, %v614_v48, 0.0 }
 0x141   : > { %v618_v51 = vadd.f32 %v617_v50, %v616_v49 }
 0x143   : > { %v619_v52 = vrot.slane %v618_v51, 4 }
 0x145   : > { %v620_v53 = vadd.f32 %v619_v52, %v618_v51 }
 0x147   : > { %v621_v54 = vrot.slane %v620_v53, 2 }
 0x149   : > { %v622_v55 = vadd.f32 %v621_v54, %v620_v53 }
 0x14b   : > { %v623_v56 = vrot.slane %v622_v55, 1 }
 0x14d   : > { %v624_v57 = vadd.f32 %v623_v56, %v622_v55 }
 0x14f   : > { %v625_v60 = vmax.f32 %v624_v57, 0.0 }
 0x151   : > { %v628_v61 = vmul.f32 %v626_v58, %v625_v60  ;;  %v629_v62 = vmul.f32 %v627_v59, %v625_v60 }
 0x153   : > { %v991_v63 = vmul.f32 -1.442695, %v628_v61  ;;  %v992_v0 = vmul.f32 -1.442695, %v629_v62 }
 0x155   : > { %1076 = vpow2.f32 %v991_v63 }
 0x156   : > { %1078 = vpow2.f32 %v992_v0 }
 0x15b   : > { %v1077_v5 = vpop.eup %1076 }
 0x15c   : > { %v1079_v6 = vpop.eup %1078  ;;  %v638_v7 = vadd.f32 1.0, %v1077_v5 }
 0x15d   : > { %v639_v8 = vadd.f32 1.0, %v1079_v6 }
 0x15e   : > { %1080 = vrcp.f32 %v638_v7  ;;  %vm645_vm9 = vweird.f32 %v638_v7  ;;  %v651_v12 = vand.u32 2147483648, %v638_v7  ;;  %v649_v15 = vand.u32 2147483647, %v638_v7 }
 0x15f   : > { %1082 = vrcp.f32 %v639_v8  ;;  %v666_v17 = vand.u32 2147483648, %v639_v8  ;;  %vm660_vm11 = vweird.f32 %v639_v8  ;;  %v664_v20 = vand.u32 2147483647, %v639_v8 }
 0x160   : > { %v652_v22 = vor.u32 1.1754944e-38, %v651_v12  ;;  %vm650_vm14 = vcmp.eq.f32.partialorder %v649_v15, 8.507059e+37 }
 0x161   : > { %v667_v27 = vor.u32 1.1754944e-38, %v666_v17  ;;  %vm665_vm1 = vcmp.eq.f32.partialorder %v664_v20, 8.507059e+37 }
 0x164   : > { %v1081_v9 = vpop.eup %1080 }
 0x165   : > { %v1083_v10 = vpop.eup %1082  ;;  %v641_v11 = vmul.f32 %v1081_v9, %v638_v7  ;;  %vm646_vm10 = vweird.f32 %v1081_v9 }
 0x166   : > { %v656_v13 = vmul.f32 %v1083_v10, %v639_v8  ;;  %vm661_vm12 = vweird.f32 %v1083_v10  ;;  %vm647_vm13 = vmor %vm645_vm9, %vm646_vm10 }
 0x167   : > { %v642_v14 = vsub.f32 1.0, %v641_v11  ;;  %vm662_vm15 = vmor %vm660_vm11, %vm661_vm12 }
 0x168   : > { %v657_v19 = vsub.f32 1.0, %v656_v13 }
 0x169   : > { %v643_v21 = vmul.f32 %v1081_v9, %v642_v14 }
 0x16a   : > { %v658_v23 = vmul.f32 %v1083_v10, %v657_v19 }
 0x16b   : > { %v644_v24 = vadd.f32 %v1081_v9, %v643_v21 }
 0x16c   : > { %v659_v28 = vadd.f32 %v1083_v10, %v658_v23 }
 0x16d   : > { %v648_v29 = vsel %vm647_vm13, %v1081_v9, %v644_v24 }
 0x16e   : > { %v653_v30 = vsel %vm650_vm14, %v652_v22, %v648_v29  ;;  %v663_v31 = vsel %vm662_vm15, %v1083_v10, %v659_v28 }
 0x16f   : > { %670 = vst.msk [vmem:[#allocation3] sm:$0xff] %vm615_vm8, %v653_v30  ;;  %v668_v32 = vsel %vm665_vm1, %v667_v27, %v663_v31 }
 0x170   : > { %671 = vst.msk [vmem:[#allocation3 + $0x8] sm:$0xff] %vm615_vm8, %v668_v32 }
 0x171 PF: > { %p993_p11 = scmp.ne.s32.totalorder %s1116_s24, 1 }
 0x173   : > { %674 = sbr.rel (%p993_p11) target bundleno = 643 (0x283), region = 64 }
 0x178   : > { %v678_v33 = vld [vmem:[#allocation3 + $0x8] sm:$0xff]  ;;  %v1144_v34 = vmov 0   ;;  %v677_v35 = vld [vmem:[#allocation3] sm:$0xff]  ;;  %v693_v36 = vld [vmem:[%s1250_s15] sm:$0xff] }
 0x179   : > { %1084 = vset.pattern.permute.xlu0 %v1144_v34  ;;  %1085 = vset.pattern.permute.xlu1 %v1144_v34  ;;  %v694_v37 = vld [vmem:[%s1250_s15 + $0x8] sm:$0xff]  ;;  %v675_v44 = vld [vmem:[%s1245_s25] sm:$0xff] }
 0x17a   : > { %686 = vperm.xlu0 %1084, %v678_v33   ;;  %697 = vperm.xlu1 %1085, %v693_v36   ;;  %v676_v45 = vld [vmem:[%s1245_s25 + $0x8] sm:$0xff] }
 0x182   : > { %681 = vperm.xlu0 %1084, %v677_v35   ;;  %702 = vperm.xlu1 %1085, %v694_v37  }
 0x1ec   : > { %v687_v38 = vpop.permute.xlu0 %686 }
 0x1ed   : > { %v691_v39 = vmul.f32 %v687_v38, %v1288_v25  ;;  %v692_v40 = vmul.f32 %v687_v38, %v1290_v26  ;;  %v698_v25 = vpop.permute.xlu1 %697 }
 0x1ef   : > { %725 = vmatpush.msra.mxu0 %v691_v39  ;;  %1012 = vmatpush.msra.mxu2 %v691_v39 }
 0x1f0   : > { %748 = vmatpush.msra.mxu1 %v692_v40  ;;  %1014 = vmatpush.msra.mxu3 %v692_v40 }
 0x1f4   : > { %v682_v41 = vpop.permute.xlu0 %681 }
 0x1f5   : > { %v689_v42 = vmul.f32 %v682_v41, %v1284_v16  ;;  %v690_v43 = vmul.f32 %v682_v41, %v1286_v18  ;;  %v703_v49 = vpop.permute.xlu1 %702 }
 0x1f7   : > { %726 = vmatpush.msra.mxu0 %v689_v42  ;;  %1013 = vmatpush.msra.mxu2 %v689_v42 }
 0x1f8   : > { %749 = vmatpush.msra.mxu1 %v690_v43  ;;  %1015 = vmatpush.msra.mxu3 %v690_v43 }
 0x1f9   : > { %994 = vmatmul.msk.f32.vlgmr.msra.gmra.mxu0 %vm499_vm0, %v675_v44  ;;  %995 = vmatmul.msk.f32.vlgmr.msra.gmra.mxu2 %vm499_vm0, %v676_v45 }
 0x1fa   : > { %996 = vmatmul.msk.f32.vlgmr.msra.gmra.mxu1 %vm499_vm0, %v675_v44  ;;  %997 = vmatmul.msk.f32.vlgmr.msra.gmra.mxu3 %vm499_vm0, %v676_v45 }
 0x276   : > { %v728_v16 = vpop.f32.mrf.mxu0 }
 0x277   : > { %v729_v18 = vadd.f32 %v728_v16, %v698_v25  ;;  %v751_v26 = vpop.f32.mrf.mxu1 }
 0x278   : > { %v752_v46 = vadd.f32 %v751_v26, %v698_v25 }
 0x279   : > { %v757_v47 = vadd.f32 %v729_v18, %v1261_v3 }
 0x27a   : > { %v758_v48 = vadd.f32 %v752_v46, %v1265_v4 }
 0x27b   : > { %761 = vst [vmem:[%s1255_s19] sm:$0xff] %v757_v47 }
 0x27c   : > { %762 = vst [vmem:[%s1255_s19 + $0x8] sm:$0xff] %v758_v48  ;;  %v731_v50 = vpop.f32.mrf.mxu2 }
 0x27d   : > { %v732_v51 = vadd.f32 %v731_v50, %v703_v49  ;;  %v754_v52 = vpop.f32.mrf.mxu3 }
 0x27e   : > { %v755_v53 = vadd.f32 %v754_v52, %v703_v49 }
 0x27f   : > { %v759_v54 = vadd.f32 %v732_v51, %v1257_v1 }
 0x280   : > { %v760_v55 = vadd.f32 %v755_v53, %v1259_v2 }
 0x281   : > { %763 = vst [vmem:[%s1255_s19 + $0x10] sm:$0xff] %v759_v54 }
 0x282   : > { %764 = vst [vmem:[%s1255_s19 + $0x18] sm:$0xff] %v760_v55 }
 0x283 PF: > { %s17_s30 = sadd.s32 1, %s1140_s30   ;;  %s1360_s10 = sld [smem:[#allocation4_spill]] }
 0x284   : > { %p14_p12 = scmp.ge.s32.totalorder %s17_s30, 10   ;;  %s1361_s13 = sld [smem:[#allocation5_spill]] }
 0x285   : > { %s1362_s24 = smov %s1128_s27  ;;  %s1363_s25 = smov %s1132_s28 }
 0x286   : > { %s1364_s26 = smov %s1136_s29  ;;  %s1365_s27 = smov %s1369_s8 }
 0x287   :  { %16 = sbr.rel (!%p14_p12) target bundleno = 4 (0x4), region = 112 }
 0x289   : > { %s1366_s28 = smov %s1360_s10 }
 0x28a   : > { %s1367_s29 = smov %s1361_s13 }

// kernel: reverse.1
= control target key start
LH: loop header
LB: loop body
LE: loop exit
PB: predicated region body
PF: predicated region fallthrough
CT: control target
= control target key end

     0   :  { %s344_s0 = inlined_call_operand.vmem [shape: f32[2,16,16,7], index: 0, kind: input, shape index: {}]   ;;  %s345_s1 = inlined_call_operand.vmem [shape: f32[2,16,16,7], index: 1, kind: output, shape index: {}]  }
   0x1   :  { %v112_v0 = vld [vmem:[%s344_s0 + $0x60] sm:$0xff]  ;;  %v113_v1 = vld [vmem:[%s344_s0 + $0xd0] sm:$0xff]  ;;  %v138_v14 = vld [vmem:[%s344_s0 + $0x68] sm:$0xff] }
   0x2   :  { %v115_v2 = vld [vmem:[%s344_s0 + $0x50] sm:$0xff]  ;;  %4 = vst [vmem:[%s345_s1] sm:$0xff] %v112_v0  ;;  %v117_v3 = vld [vmem:[%s344_s0 + $0xc0] sm:$0xff]  ;;  %v140_v15 = vld [vmem:[%s344_s0 + $0xd8] sm:$0xff] }
   0x3   :  { %114 = vst [vmem:[%s345_s1 + $0x70] sm:$0xff] %v113_v1  ;;  %v119_v4 = vld [vmem:[%s344_s0 + $0x40] sm:$0xff]  ;;  %v121_v5 = vld [vmem:[%s344_s0 + $0xb0] sm:$0xff]  ;;  %v142_v16 = vld [vmem:[%s344_s0 + $0x58] sm:$0xff] }
   0x4   :  { %116 = vst [vmem:[%s345_s1 + $0x10] sm:$0xff] %v115_v2  ;;  %v123_v6 = vld [vmem:[%s344_s0 + $0x30] sm:$0xff]  ;;  %v125_v7 = vld [vmem:[%s344_s0 + $0xa0] sm:$0xff]  ;;  %v144_v17 = vld [vmem:[%s344_s0 + $0xc8] sm:$0xff] }
   0x5   :  { %118 = vst [vmem:[%s345_s1 + $0x80] sm:$0xff] %v117_v3  ;;  %v127_v8 = vld [vmem:[%s344_s0 + $0x20] sm:$0xff]  ;;  %v129_v9 = vld [vmem:[%s344_s0 + $0x90] sm:$0xff]  ;;  %v146_v18 = vld [vmem:[%s344_s0 + $0x48] sm:$0xff] }
   0x6   :  { %120 = vst [vmem:[%s345_s1 + $0x20] sm:$0xff] %v119_v4  ;;  %v131_v10 = vld [vmem:[%s344_s0 + $0x10] sm:$0xff]  ;;  %v133_v11 = vld [vmem:[%s344_s0 + $0x80] sm:$0xff]  ;;  %v148_v19 = vld [vmem:[%s344_s0 + $0xb8] sm:$0xff] }
   0x7   :  { %122 = vst [vmem:[%s345_s1 + $0x90] sm:$0xff] %v121_v5  ;;  %v49_v12 = vld [vmem:[%s344_s0] sm:$0xff]  ;;  %v136_v13 = vld [vmem:[%s344_s0 + $0x70] sm:$0xff]  ;;  %v150_v20 = vld [vmem:[%s344_s0 + $0x38] sm:$0xff] }
   0x8   :  { %124 = vst [vmem:[%s345_s1 + $0x30] sm:$0xff] %v123_v6  ;;  %v152_v21 = vld [vmem:[%s344_s0 + $0xa8] sm:$0xff]  ;;  %v156_v23 = vld [vmem:[%s344_s0 + $0x98] sm:$0xff] }
   0x9   :  { %126 = vst [vmem:[%s345_s1 + $0xa0] sm:$0xff] %v125_v7  ;;  %v154_v22 = vld [vmem:[%s344_s0 + $0x28] sm:$0xff]  ;;  %v158_v24 = vld [vmem:[%s344_s0 + $0x18] sm:$0xff] }
   0xa   :  { %128 = vst [vmem:[%s345_s1 + $0x40] sm:$0xff] %v127_v8  ;;  %v160_v25 = vld [vmem:[%s344_s0 + $0x88] sm:$0xff]  ;;  %v164_v27 = vld [vmem:[%s344_s0 + $0x78] sm:$0xff] }
   0xb   :  { %130 = vst [vmem:[%s345_s1 + $0xb0] sm:$0xff] %v129_v9  ;;  %v162_v26 = vld [vmem:[%s344_s0 + $0x8] sm:$0xff] }
   0xc   :  { %132 = vst [vmem:[%s345_s1 + $0x50] sm:$0xff] %v131_v10 }
   0xd   :  { %134 = vst [vmem:[%s345_s1 + $0xc0] sm:$0xff] %v133_v11 }
   0xe   :  { %135 = vst [vmem:[%s345_s1 + $0x60] sm:$0xff] %v49_v12 }
   0xf   :  { %137 = vst [vmem:[%s345_s1 + $0xd0] sm:$0xff] %v136_v13 }
  0x10   :  { %139 = vst [vmem:[%s345_s1 + $0x8] sm:$0xff] %v138_v14 }
  0x11   :  { %141 = vst [vmem:[%s345_s1 + $0x78] sm:$0xff] %v140_v15 }
  0x12   :  { %143 = vst [vmem:[%s345_s1 + $0x18] sm:$0xff] %v142_v16 }
  0x13   :  { %145 = vst [vmem:[%s345_s1 + $0x88] sm:$0xff] %v144_v17 }
  0x14   :  { %147 = vst [vmem:[%s345_s1 + $0x28] sm:$0xff] %v146_v18 }
  0x15   :  { %149 = vst [vmem:[%s345_s1 + $0x98] sm:$0xff] %v148_v19 }
  0x16   :  { %151 = vst [vmem:[%s345_s1 + $0x38] sm:$0xff] %v150_v20 }
  0x17   :  { %153 = vst [vmem:[%s345_s1 + $0xa8] sm:$0xff] %v152_v21 }
  0x18   :  { %155 = vst [vmem:[%s345_s1 + $0x48] sm:$0xff] %v154_v22 }
  0x19   :  { %157 = vst [vmem:[%s345_s1 + $0xb8] sm:$0xff] %v156_v23 }
  0x1a   :  { %159 = vst [vmem:[%s345_s1 + $0x58] sm:$0xff] %v158_v24 }
  0x1b   :  { %161 = vst [vmem:[%s345_s1 + $0xc8] sm:$0xff] %v160_v25 }
  0x1c   :  { %163 = vst [vmem:[%s345_s1 + $0x68] sm:$0xff] %v162_v26 }
  0x1d   :  { %165 = vst [vmem:[%s345_s1 + $0xd8] sm:$0xff] %v164_v27 }

</bundles_post_ra>
